<compile_context>
chip_gen: v7x
topology: tpu7x:2x2x1
jax: 0.10.0
libtpu: 0.0.40
codegen_flags: <defaults>
</compile_context>

<pallas_src>
import functools
import math

import jax
import jax.numpy as jnp
from jax.experimental import pallas as pl
from jax.experimental.pallas import tpu as pltpu


# ---------------------------------------------------------------------------
# In-kernel math helpers (exp / mul / where / rsqrt only -> safe Mosaic ops)
# ---------------------------------------------------------------------------
def _erf(x):
    # Abramowitz & Stegun 7.1.26 rational approximation, |abs err| <= 1.5e-7.
    a1, a2, a3, a4, a5 = (0.254829592, -0.284496736, 1.421413741,
                          -1.453152027, 1.061405429)
    p = 0.3275911
    ax = jnp.abs(x)
    t = 1.0 / (1.0 + p * ax)
    poly = ((((a5 * t + a4) * t + a3) * t + a2) * t + a1) * t
    y = 1.0 - poly * jnp.exp(-ax * ax)
    return jnp.where(x >= 0, y, -y)


def _gelu_exact(x):
    # torch.nn.GELU() default = exact erf-based GELU.
    return 0.5 * x * (1.0 + _erf(x * 0.7071067811865476))


def _sigmoid(x, approx=False):
    e = jnp.exp(-x)
    if approx:
        # EUP reciprocal (free slot) on the perf path.
        return pl.reciprocal(1.0 + e, approx=True)
    return 1.0 / (1.0 + e)


def _layer_norm(x, w, b, eps=1e-5):
    mu = jnp.mean(x, axis=-1, keepdims=True)
    d = x - mu
    var = jnp.mean(d * d, axis=-1, keepdims=True)
    return d * jax.lax.rsqrt(var + eps) * w + b


# ---------------------------------------------------------------------------
# Kernel
# ---------------------------------------------------------------------------
def retnet_block_kernel(x_ref, wqkv_ref, bqkv_ref, cos_ref, sin_ref, decay_ref,
                        lnw_ref, lnb_ref, wg1_ref, bg1_ref, wg2_ref, bg2_ref,
                        wf1_ref, bf1_ref, wf2_ref, bf2_ref, o_ref,
                        *, bt, S, F, tk, matmul_dtype, approx_recip):
    md = matmul_dtype
    x = x_ref[...]                                    # (bt*S, F) f32

    def mm(a, b):
        return jnp.dot(a.astype(md), b.astype(md),
                       preferred_element_type=jnp.float32)

    # ---- fused projection [q | k | v] (gate.ff1 is computed later on purpose)
    proj = mm(x, wqkv_ref[...]) + bqkv_ref[...]       # (bt*S, 3F) f32
    q = proj[:, 0 * F:1 * F].reshape(bt, S, F)
    k = proj[:, 1 * F:2 * F].reshape(bt, S, F)
    v = proj[:, 2 * F:3 * F].reshape(bt, S, F).astype(md)

    cos = cos_ref[...]                                # (S, F)
    sin = sin_ref[...]
    qc = (q * cos).astype(md)
    qs = (q * sin).astype(md)
    kc = (k * cos).astype(md)
    ks = (k * sin).astype(md)
    decay = decay_ref[...]                            # (S, S) f32, precomputed

    # ---- retention, flash-style loop over k/v blocks -----------------------
    # Only (bt, S, tk) score tiles are ever live; decay is sliced per block.
    ret = jnp.zeros((bt, S, F), jnp.float32)
    for kb in range(S // tk):
        ko = kb * tk
        a = jnp.einsum('bsf,btf->bst', qc, kc[:, ko:ko + tk, :],
                       preferred_element_type=jnp.float32)
        a = a + jnp.einsum('bsf,btf->bst', qs, ks[:, ko:ko + tk, :],
                           preferred_element_type=jnp.float32)
        a = a * decay[:, ko:ko + tk]
        ret = ret + jnp.einsum('bst,btf->bsf', a.astype(md),
                               v[:, ko:ko + tk, :],
                               preferred_element_type=jnp.float32)
    ret = ret.reshape(bt * S, F)

    lnw = lnw_ref[...]
    lnb = lnb_ref[...]

    # ---- y = norm(retention(x)) ---------------------------------------------
    y = _layer_norm(ret, lnw, lnb)

    # ---- y = gate(x, y) + x  (SwishGate; ff1 computed here -> short live range)
    g = mm(x, wg1_ref[...]) + bg1_ref[...]
    g = g * _sigmoid(g, approx_recip)
    g = g * y
    y = mm(g, wg2_ref[...]) + bg2_ref[...] + x

    # ---- out = ffn(norm(y)) + y ----------------------------------------------
    z = _layer_norm(y, lnw, lnb)
    h = mm(z, wf1_ref[...]) + bf1_ref[...]
    h = _gelu_exact(h)
    out = mm(h, wf2_ref[...]) + bf2_ref[...] + y

    o_ref[...] = out.astype(o_ref.dtype)


# ---------------------------------------------------------------------------
# Wrapper helpers
# ---------------------------------------------------------------------------
def _vmem_limit_bytes():
    """Explicit scoped-VMEM budget derived from the chip (v7x has only 64 MiB)."""
    try:
        cap = int(pltpu.get_tpu_info().vmem_capacity_bytes)
    except Exception:
        cap = 64 * 1024 * 1024
    return max(32 * 1024 * 1024, min(int(cap * 0.85), 100 * 1024 * 1024))


def _choose_kv_block(S, target=512):
    """Largest divisor of S that is <= target (k/v block for retention tiling)."""
    tk = min(S, target)
    while S % tk:
        tk -= 1
    return tk


def _est_vmem_bytes(bt, S, F, tk):
    rows = bt * S
    act = 4 * rows * F * 16            # x, proj(3F), q/k/v, qc/qs/kc/ks, ret, y, g, h, out
    scores = 4 * bt * S * tk * 3       # live score tiles inside the k-block loop
    io = 4 * rows * F * 4              # double-buffered x / out tiles
    consts = 4 * (7 * F * F + S * S + 2 * S * F + 16 * F)   # single-buffered consts
    return act + scores + io + consts


def _choose_block_b(B, S, F, tk, *, vmem_limit, target_rows=512, min_grid_steps=2):
    """Fold batches per grid step, keep >=2 grid steps (v7x) and fit VMEM."""
    bt = max(1, min(B, max(1, target_rows // max(S, 1))))
    steps = min(min_grid_steps, B)                 # megacore: don't collapse to grid=(1,)
    bt = min(bt, max(1, B // steps))
    while B % bt:
        bt -= 1
    while bt > 1 and _est_vmem_bytes(bt, S, F, tk) > 0.6 * vmem_limit:
        bt -= 1
        while B % bt:
            bt -= 1
    return bt


def _decay_mask(S, gamma):
    i = jnp.arange(S, dtype=jnp.float32)[:, None]
    j = jnp.arange(S, dtype=jnp.float32)[None, :]
    d = i - j
    return jnp.where(d >= 0.0, jnp.power(gamma, jnp.maximum(d, 0.0)), 0.0)


# ---------------------------------------------------------------------------
# Wrapper
# ---------------------------------------------------------------------------
def retnet_block(x, params, gamma, *, block_b=None, kv_block=None,
                 matmul_dtype=jnp.bfloat16, min_grid_steps=2):
    B, S, F = x.shape
    vmem_limit = _vmem_limit_bytes()
    tk = kv_block or _choose_kv_block(S)
    bt = block_b or _choose_block_b(B, S, F, tk, vmem_limit=vmem_limit,
                                    min_grid_steps=min_grid_steps)
    rows = bt * S
    grid = (B // bt,)

    # Pre-transpose torch-layout (out,in) weights to (in,out); fuse q/k/v into
    # one (F, 3F) projection (no q/k duplication -> no extra MXU FLOPs/VMEM).
    w_qkv = jnp.concatenate([params['wq'].T, params['wk'].T, params['wv'].T],
                            axis=1)                                # (F, 3F)
    b_qkv = jnp.concatenate([params['bq'], params['bk'], params['bv']],
                            axis=1)                                # (1, 3F)
    decay = _decay_mask(S, gamma)          # computed ONCE, grid-constant input

    x2 = x.reshape(B * S, F)
    approx_recip = bool(jnp.dtype(matmul_dtype) != jnp.dtype(jnp.float32))

    kernel = functools.partial(retnet_block_kernel, bt=bt, S=S, F=F, tk=tk,
                               matmul_dtype=matmul_dtype,
                               approx_recip=approx_recip)

    flops = 14 * B * S * F * F + 6 * B * S * S * F
    transcendentals = 3 * B * S * F
    bytes_accessed = 4 * (2 * B * S * F + 7 * F * F + S * S + 2 * S * F + 16 * F)
    cost = pl.CostEstimate(flops=flops, transcendentals=transcendentals,
                           bytes_accessed=bytes_accessed)

    row_spec = pl.BlockSpec((rows, F), lambda i: (i, 0))
    operands = (x2, w_qkv, b_qkv, params['cos'], params['sin'], decay,
                params['ln_w'], params['ln_b'],
                params['wg1'].T, params['bg1'], params['wg2'].T, params['bg2'],
                params['wf1'].T, params['bf1'], params['wf2'].T, params['bf2'])
    const_shapes = [(F, 3 * F), (1, 3 * F), (S, F), (S, F), (S, S),
                    (1, F), (1, F),
                    (F, F), (1, F), (F, F), (1, F),
                    (F, F), (1, F), (F, F), (1, F)]

    def build(single_buffer_consts):
        def const_spec(shape):
            if single_buffer_consts:
                # Grid-constant operands: a second pipeline buffer is wasted VMEM.
                return pl.BlockSpec(shape, lambda i: (0, 0),
                                    pipeline_mode=pl.Buffered(1))
            return pl.BlockSpec(shape, lambda i: (0, 0))

        return pl.pallas_call(
            kernel,
            out_shape=jax.ShapeDtypeStruct((B * S, F), jnp.float32),
            grid=grid,
            in_specs=[row_spec] + [const_spec(s) for s in const_shapes],
            out_specs=row_spec,
            compiler_params=pltpu.CompilerParams(
                dimension_semantics=("parallel",),
                vmem_limit_bytes=int(vmem_limit)),
            cost_estimate=cost,
        )

    try:
        out2 = build(True)(*operands)       # single-buffer the constants
    except Exception:
        # pipeline_mode=pl.Buffered(1) not supported on this jax/libtpu combo;
        # fall back to default double-buffering (correctness unchanged).
        out2 = build(False)(*operands)

    return out2.reshape(B, S, F)


# ---------------------------------------------------------------------------
# Parameters (torch layouts / inits) and pure-JAX reference
# ---------------------------------------------------------------------------
def make_params(key, num_sequence, num_feature):
    ks = jax.random.split(key, 15)
    bound = 1.0 / math.sqrt(num_feature)

    def lin(kw, kb):
        w = jax.random.uniform(kw, (num_feature, num_feature), jnp.float32,
                               -bound, bound)
        b = jax.random.uniform(kb, (1, num_feature), jnp.float32,
                               -bound, bound)
        return w, b

    wq, bq = lin(ks[0], ks[1])
    wk, bk = lin(ks[2], ks[3])
    wv, bv = lin(ks[4], ks[5])
    wg1, bg1 = lin(ks[6], ks[7])
    wg2, bg2 = lin(ks[8], ks[9])
    wf1, bf1 = lin(ks[10], ks[11])
    wf2, bf2 = lin(ks[12], ks[13])

    theta = jax.random.uniform(ks[14], (1, num_feature), jnp.float32)   # th.rand
    index = jnp.arange(1, num_sequence + 1, dtype=jnp.float32)[:, None]
    mask_theta = index @ theta                                          # (S, F)
    cos = jnp.cos(mask_theta)
    sin = jnp.sin(mask_theta)

    ln_w = jnp.ones((1, num_feature), jnp.float32)    # nn.LayerNorm init
    ln_b = jnp.zeros((1, num_feature), jnp.float32)

    return dict(wq=wq, bq=bq, wk=wk, bk=bk, wv=wv, bv=bv,
                wg1=wg1, bg1=bg1, wg2=wg2, bg2=bg2,
                wf1=wf1, bf1=bf1, wf2=wf2, bf2=bf2,
                cos=cos, sin=sin, ln_w=ln_w, ln_b=ln_b)


def reference(x, params, gamma):
    S = x.shape[1]
    cos, sin = params['cos'], params['sin']
    i = jnp.arange(S, dtype=jnp.float32)[:, None]
    j = jnp.arange(S, dtype=jnp.float32)[None, :]
    decay = jnp.where(j <= i, gamma ** (i - j), 0.0)

    def linear(t, w, b):
        return t @ w.T + b

    def layer_norm(t, w, b, eps=1e-5):
        mu = t.mean(-1, keepdims=True)
        var = ((t - mu) ** 2).mean(-1, keepdims=True)
        return (t - mu) / jnp.sqrt(var + eps) * w + b

    q = linear(x, params['wq'], params['bq'])
    k = linear(x, params['wk'], params['bk'])
    v = linear(x, params['wv'], params['bv'])
    a = (jnp.einsum('bsf,btf->bst', q * cos, k * cos)
         + jnp.einsum('bsf,btf->bst', q * sin, k * sin))
    a = a * decay
    ret = jnp.einsum('bst,btf->bsf', a, v)

    y = layer_norm(ret, params['ln_w'], params['ln_b'])

    g = linear(x, params['wg1'], params['bg1'])
    g = g * jax.nn.sigmoid(g)
    g = g * y
    y = linear(g, params['wg2'], params['bg2']) + x

    z = layer_norm(y, params['ln_w'], params['ln_b'])
    h = linear(z, params['wf1'], params['bf1'])
    h = jax.nn.gelu(h, approximate=False)
    return linear(h, params['wf2'], params['bf2']) + y


if __name__ == "__main__":
    B, S, F = 2, 8, 32
    gamma = 0.9

    key = jax.random.PRNGKey(0)
    kx, kp = jax.random.split(key)
    x = jax.random.normal(kx, (B, S, F), jnp.float32)
    params = make_params(kp, S, F)
    ref = reference(x, params, gamma)

    # Strict correctness check with f32 MXU operands.
    out_f32 = jax.block_until_ready(
        retnet_block(x, params, gamma, matmul_dtype=jnp.float32))
    assert out_f32.shape == (B, S, F)
    assert jnp.allclose(out_f32, ref, atol=2e-4, rtol=2e-4), \
        "f32 mismatch vs reference"

    # Default (perf) path: bf16 MXU operands with f32 accumulation.
    out = jax.block_until_ready(retnet_block(x, params, gamma))
    assert out.shape == (B, S, F)
    assert jnp.allclose(out, ref, atol=8e-2, rtol=5e-2), \
        "bf16 mismatch vs reference"

    print("KERNEL_OK")
</pallas_src>

<mosaic_0001>
module attributes {stable_mosaic.version = 11 : i64} {
  func.func @retnet_block_kernel(%arg0: i32, %arg1: memref<8x32xf32, #tpu.memory_space<vmem>>, %arg2: memref<32x96xf32, #tpu.memory_space<vmem>>, %arg3: memref<1x96xf32, #tpu.memory_space<vmem>>, %arg4: memref<8x32xf32, #tpu.memory_space<vmem>>, %arg5: memref<8x32xf32, #tpu.memory_space<vmem>>, %arg6: memref<8x8xf32, #tpu.memory_space<vmem>>, %arg7: memref<1x32xf32, #tpu.memory_space<vmem>>, %arg8: memref<1x32xf32, #tpu.memory_space<vmem>>, %arg9: memref<32x32xf32, #tpu.memory_space<vmem>>, %arg10: memref<1x32xf32, #tpu.memory_space<vmem>>, %arg11: memref<32x32xf32, #tpu.memory_space<vmem>>, %arg12: memref<1x32xf32, #tpu.memory_space<vmem>>, %arg13: memref<32x32xf32, #tpu.memory_space<vmem>>, %arg14: memref<1x32xf32, #tpu.memory_space<vmem>>, %arg15: memref<32x32xf32, #tpu.memory_space<vmem>>, %arg16: memref<1x32xf32, #tpu.memory_space<vmem>>, %arg17: memref<8x32xf32, #tpu.memory_space<vmem>>) attributes {dimension_semantics = [#tpu.dimension_semantics<parallel>], iteration_bounds = array<i64: 2>, scalar_prefetch = 0 : i64, scratch_operands = 0 : i64, tpu.core_type = #tpu.core_type<tc>, window_params = [{transform_indices = @transform_0, window_bounds = array<i64: 8, 32>}, {pipeline_mode = #tpu.pipeline_mode<synchronous>, transform_indices = @transform_1, window_bounds = array<i64: 32, 96>}, {pipeline_mode = #tpu.pipeline_mode<synchronous>, transform_indices = @transform_2, window_bounds = array<i64: 1, 96>}, {pipeline_mode = #tpu.pipeline_mode<synchronous>, transform_indices = @transform_3, window_bounds = array<i64: 8, 32>}, {pipeline_mode = #tpu.pipeline_mode<synchronous>, transform_indices = @transform_4, window_bounds = array<i64: 8, 32>}, {pipeline_mode = #tpu.pipeline_mode<synchronous>, transform_indices = @transform_5, window_bounds = array<i64: 8, 8>}, {pipeline_mode = #tpu.pipeline_mode<synchronous>, transform_indices = @transform_6, window_bounds = array<i64: 1, 32>}, {pipeline_mode = #tpu.pipeline_mode<synchronous>, transform_indices = @transform_7, window_bounds = array<i64: 1, 32>}, {pipeline_mode = #tpu.pipeline_mode<synchronous>, transform_indices = @transform_8, window_bounds = array<i64: 32, 32>}, {pipeline_mode = #tpu.pipeline_mode<synchronous>, transform_indices = @transform_9, window_bounds = array<i64: 1, 32>}, {pipeline_mode = #tpu.pipeline_mode<synchronous>, transform_indices = @transform_10, window_bounds = array<i64: 32, 32>}, {pipeline_mode = #tpu.pipeline_mode<synchronous>, transform_indices = @transform_11, window_bounds = array<i64: 1, 32>}, {pipeline_mode = #tpu.pipeline_mode<synchronous>, transform_indices = @transform_12, window_bounds = array<i64: 32, 32>}, {pipeline_mode = #tpu.pipeline_mode<synchronous>, transform_indices = @transform_13, window_bounds = array<i64: 1, 32>}, {pipeline_mode = #tpu.pipeline_mode<synchronous>, transform_indices = @transform_14, window_bounds = array<i64: 32, 32>}, {pipeline_mode = #tpu.pipeline_mode<synchronous>, transform_indices = @transform_15, window_bounds = array<i64: 1, 32>}, {transform_indices = @transform_16, window_bounds = array<i64: 8, 32>}]} {
    %c0 = arith.constant 0 : index
    %c0_0 = arith.constant 0 : index
    %0 = vector.load %arg1[%c0, %c0_0] : memref<8x32xf32, #tpu.memory_space<vmem>>, vector<8x32xf32>
    %c0_1 = arith.constant 0 : index
    %c0_2 = arith.constant 0 : index
    %1 = vector.load %arg2[%c0_1, %c0_2] : memref<32x96xf32, #tpu.memory_space<vmem>>, vector<32x96xf32>
    %cst = arith.constant dense<0.000000e+00> : vector<8x96xf32>
    %2 = tpu.matmul %0, %1, %cst {dimension_numbers = #tpu.dot_dimension_numbers<[1], [0], [0], [1], [0, 0, 1, 1], [], []>} : vector<8x32xf32>, vector<32x96xf32>, vector<8x96xf32> -> vector<8x96xf32>
    %c0_3 = arith.constant 0 : index
    %c0_4 = arith.constant 0 : index
    %3 = vector.load %arg3[%c0_3, %c0_4] : memref<1x96xf32, #tpu.memory_space<vmem>>, vector<1x96xf32>
    %4 = vector.broadcast %3 : vector<1x96xf32> to vector<8x96xf32>
    %5 = arith.addf %2, %4 : vector<8x96xf32>
    %6 = vector.extract_strided_slice %5 {offsets = [0, 0], sizes = [8, 32], strides = [1, 1]} : vector<8x96xf32> to vector<8x32xf32>
    %7 = vector.shape_cast %6 : vector<8x32xf32> to vector<1x8x32xf32>
    %8 = vector.extract_strided_slice %5 {offsets = [0, 32], sizes = [8, 32], strides = [1, 1]} : vector<8x96xf32> to vector<8x32xf32>
    %9 = vector.shape_cast %8 : vector<8x32xf32> to vector<1x8x32xf32>
    %10 = vector.extract_strided_slice %5 {offsets = [0, 64], sizes = [8, 32], strides = [1, 1]} : vector<8x96xf32> to vector<8x32xf32>
    %11 = vector.shape_cast %10 : vector<8x32xf32> to vector<1x8x32xf32>
    %c0_5 = arith.constant 0 : index
    %c0_6 = arith.constant 0 : index
    %12 = vector.load %arg4[%c0_5, %c0_6] : memref<8x32xf32, #tpu.memory_space<vmem>>, vector<8x32xf32>
    %c0_7 = arith.constant 0 : index
    %c0_8 = arith.constant 0 : index
    %13 = vector.load %arg5[%c0_7, %c0_8] : memref<8x32xf32, #tpu.memory_space<vmem>>, vector<8x32xf32>
    %14 = vector.shape_cast %12 : vector<8x32xf32> to vector<1x8x32xf32>
    %15 = arith.mulf %7, %14 : vector<1x8x32xf32>
    %16 = vector.shape_cast %13 : vector<8x32xf32> to vector<1x8x32xf32>
    %17 = arith.mulf %7, %16 : vector<1x8x32xf32>
    %18 = vector.shape_cast %12 : vector<8x32xf32> to vector<1x8x32xf32>
    %19 = arith.mulf %9, %18 : vector<1x8x32xf32>
    %20 = vector.shape_cast %13 : vector<8x32xf32> to vector<1x8x32xf32>
    %21 = arith.mulf %9, %20 : vector<1x8x32xf32>
    %c0_9 = arith.constant 0 : index
    %c0_10 = arith.constant 0 : index
    %22 = vector.load %arg6[%c0_9, %c0_10] : memref<8x8xf32, #tpu.memory_space<vmem>>, vector<8x8xf32>
    %cst_11 = arith.constant 0.000000e+00 : f32
    %23 = vector.broadcast %cst_11 : f32 to vector<1x8x32xf32>
    "tpu.trace_start"() <{level = 10 : i32, message = "bsf,btf->bst"}> : () -> ()
    %cst_12 = arith.constant dense<0.000000e+00> : vector<1x8x8xf32>
    %24 = tpu.matmul %15, %19, %cst_12 {dimension_numbers = #tpu.dot_dimension_numbers<[2], [2], [1], [1], [0, 0, 0, 1, 1, 1], [0], [0]>} : vector<1x8x32xf32>, vector<1x8x32xf32>, vector<1x8x8xf32> -> vector<1x8x8xf32>
    %cst_13 = arith.constant dense<0.000000e+00> : vector<1x8x8xf32>
    %25 = tpu.matmul %17, %21, %cst_13 {dimension_numbers = #tpu.dot_dimension_numbers<[2], [2], [1], [1], [0, 0, 0, 1, 1, 1], [0], [0]>} : vector<1x8x32xf32>, vector<1x8x32xf32>, vector<1x8x8xf32> -> vector<1x8x8xf32>
    "tpu.trace_stop"() : () -> ()
    %26 = arith.addf %24, %25 : vector<1x8x8xf32>
    %27 = vector.shape_cast %22 : vector<8x8xf32> to vector<1x8x8xf32>
    %28 = arith.mulf %26, %27 : vector<1x8x8xf32>
    "tpu.trace_start"() <{level = 10 : i32, message = "bst,btf->bsf"}> : () -> ()
    %cst_14 = arith.constant dense<0.000000e+00> : vector<1x8x32xf32>
    %29 = tpu.matmul %28, %11, %cst_14 {dimension_numbers = #tpu.dot_dimension_numbers<[2], [1], [1], [2], [0, 0, 0, 1, 1, 2], [0], [0]>} : vector<1x8x8xf32>, vector<1x8x32xf32>, vector<1x8x32xf32> -> vector<1x8x32xf32>
    "tpu.trace_stop"() : () -> ()
    %30 = arith.addf %23, %29 : vector<1x8x32xf32>
    %31 = vector.shape_cast %30 : vector<1x8x32xf32> to vector<8x32xf32>
    %c0_15 = arith.constant 0 : index
    %c0_16 = arith.constant 0 : index
    %32 = vector.load %arg7[%c0_15, %c0_16] : memref<1x32xf32, #tpu.memory_space<vmem>>, vector<1x32xf32>
    %c0_17 = arith.constant 0 : index
    %c0_18 = arith.constant 0 : index
    %33 = vector.load %arg8[%c0_17, %c0_18] : memref<1x32xf32, #tpu.memory_space<vmem>>, vector<1x32xf32>
    %cst_19 = arith.constant dense<0.000000e+00> : vector<8xf32>
    %34 = vector.multi_reduction <add>, %31, %cst_19 [1] : vector<8x32xf32> to vector<8xf32>
    %35 = vector.shape_cast %34 : vector<8xf32> to vector<8x1xf32>
    %cst_20 = arith.constant 3.200000e+01 : f32
    %36 = vector.broadcast %cst_20 : f32 to vector<8x1xf32>
    %37 = arith.divf %35, %36 : vector<8x1xf32>
    %38 = vector.broadcast %37 : vector<8x1xf32> to vector<8x32xf32>
    %39 = arith.subf %31, %38 : vector<8x32xf32>
    %40 = arith.mulf %39, %39 : vector<8x32xf32>
    %cst_21 = arith.constant dense<0.000000e+00> : vector<8xf32>
    %41 = vector.multi_reduction <add>, %40, %cst_21 [1] : vector<8x32xf32> to vector<8xf32>
    %42 = vector.shape_cast %41 : vector<8xf32> to vector<8x1xf32>
    %cst_22 = arith.constant 3.200000e+01 : f32
    %43 = vector.broadcast %cst_22 : f32 to vector<8x1xf32>
    %44 = arith.divf %42, %43 : vector<8x1xf32>
    %cst_23 = arith.constant 9.99999974E-6 : f32
    %45 = vector.broadcast %cst_23 : f32 to vector<8x1xf32>
    %46 = arith.addf %44, %45 : vector<8x1xf32>
    %47 = math.rsqrt %46 : vector<8x1xf32>
    %48 = vector.broadcast %47 : vector<8x1xf32> to vector<8x32xf32>
    %49 = arith.mulf %39, %48 : vector<8x32xf32>
    %50 = vector.broadcast %32 : vector<1x32xf32> to vector<8x32xf32>
    %51 = arith.mulf %49, %50 : vector<8x32xf32>
    %52 = vector.broadcast %33 : vector<1x32xf32> to vector<8x32xf32>
    %53 = arith.addf %51, %52 : vector<8x32xf32>
    %c0_24 = arith.constant 0 : index
    %c0_25 = arith.constant 0 : index
    %54 = vector.load %arg9[%c0_24, %c0_25] : memref<32x32xf32, #tpu.memory_space<vmem>>, vector<32x32xf32>
    %cst_26 = arith.constant dense<0.000000e+00> : vector<8x32xf32>
    %55 = tpu.matmul %0, %54, %cst_26 {dimension_numbers = #tpu.dot_dimension_numbers<[1], [0], [0], [1], [0, 0, 1, 1], [], []>} : vector<8x32xf32>, vector<32x32xf32>, vector<8x32xf32> -> vector<8x32xf32>
    %c0_27 = arith.constant 0 : index
    %c0_28 = arith.constant 0 : index
    %56 = vector.load %arg10[%c0_27, %c0_28] : memref<1x32xf32, #tpu.memory_space<vmem>>, vector<1x32xf32>
    %57 = vector.broadcast %56 : vector<1x32xf32> to vector<8x32xf32>
    %58 = arith.addf %55, %57 : vector<8x32xf32>
    %cst_29 = arith.constant 0.000000e+00 : f32
    %59 = vector.broadcast %cst_29 : f32 to vector<8x32xf32>
    %60 = arith.subf %59, %58 : vector<8x32xf32>
    %61 = math.exp %60 : vector<8x32xf32>
    %cst_30 = arith.constant 1.000000e+00 : f32
    %62 = vector.broadcast %cst_30 : f32 to vector<8x32xf32>
    %63 = arith.addf %62, %61 : vector<8x32xf32>
    %cst_31 = arith.constant 1.000000e+00 : f32
    %64 = vector.broadcast %cst_31 : f32 to vector<8x32xf32>
    %65 = arith.divf %64, %63 : vector<8x32xf32>
    %66 = arith.mulf %58, %65 : vector<8x32xf32>
    %67 = arith.mulf %66, %53 : vector<8x32xf32>
    %c0_32 = arith.constant 0 : index
    %c0_33 = arith.constant 0 : index
    %68 = vector.load %arg11[%c0_32, %c0_33] : memref<32x32xf32, #tpu.memory_space<vmem>>, vector<32x32xf32>
    %cst_34 = arith.constant dense<0.000000e+00> : vector<8x32xf32>
    %69 = tpu.matmul %67, %68, %cst_34 {dimension_numbers = #tpu.dot_dimension_numbers<[1], [0], [0], [1], [0, 0, 1, 1], [], []>} : vector<8x32xf32>, vector<32x32xf32>, vector<8x32xf32> -> vector<8x32xf32>
    %c0_35 = arith.constant 0 : index
    %c0_36 = arith.constant 0 : index
    %70 = vector.load %arg12[%c0_35, %c0_36] : memref<1x32xf32, #tpu.memory_space<vmem>>, vector<1x32xf32>
    %71 = vector.broadcast %70 : vector<1x32xf32> to vector<8x32xf32>
    %72 = arith.addf %69, %71 : vector<8x32xf32>
    %73 = arith.addf %72, %0 : vector<8x32xf32>
    %cst_37 = arith.constant dense<0.000000e+00> : vector<8xf32>
    %74 = vector.multi_reduction <add>, %73, %cst_37 [1] : vector<8x32xf32> to vector<8xf32>
    %75 = vector.shape_cast %74 : vector<8xf32> to vector<8x1xf32>
    %cst_38 = arith.constant 3.200000e+01 : f32
    %76 = vector.broadcast %cst_38 : f32 to vector<8x1xf32>
    %77 = arith.divf %75, %76 : vector<8x1xf32>
    %78 = vector.broadcast %77 : vector<8x1xf32> to vector<8x32xf32>
    %79 = arith.subf %73, %78 : vector<8x32xf32>
    %80 = arith.mulf %79, %79 : vector<8x32xf32>
    %cst_39 = arith.constant dense<0.000000e+00> : vector<8xf32>
    %81 = vector.multi_reduction <add>, %80, %cst_39 [1] : vector<8x32xf32> to vector<8xf32>
    %82 = vector.shape_cast %81 : vector<8xf32> to vector<8x1xf32>
    %cst_40 = arith.constant 3.200000e+01 : f32
    %83 = vector.broadcast %cst_40 : f32 to vector<8x1xf32>
    %84 = arith.divf %82, %83 : vector<8x1xf32>
    %cst_41 = arith.constant 9.99999974E-6 : f32
    %85 = vector.broadcast %cst_41 : f32 to vector<8x1xf32>
    %86 = arith.addf %84, %85 : vector<8x1xf32>
    %87 = math.rsqrt %86 : vector<8x1xf32>
    %88 = vector.broadcast %87 : vector<8x1xf32> to vector<8x32xf32>
    %89 = arith.mulf %79, %88 : vector<8x32xf32>
    %90 = vector.broadcast %32 : vector<1x32xf32> to vector<8x32xf32>
    %91 = arith.mulf %89, %90 : vector<8x32xf32>
    %92 = vector.broadcast %33 : vector<1x32xf32> to vector<8x32xf32>
    %93 = arith.addf %91, %92 : vector<8x32xf32>
    %c0_42 = arith.constant 0 : index
    %c0_43 = arith.constant 0 : index
    %94 = vector.load %arg13[%c0_42, %c0_43] : memref<32x32xf32, #tpu.memory_space<vmem>>, vector<32x32xf32>
    %cst_44 = arith.constant dense<0.000000e+00> : vector<8x32xf32>
    %95 = tpu.matmul %93, %94, %cst_44 {dimension_numbers = #tpu.dot_dimension_numbers<[1], [0], [0], [1], [0, 0, 1, 1], [], []>} : vector<8x32xf32>, vector<32x32xf32>, vector<8x32xf32> -> vector<8x32xf32>
    %c0_45 = arith.constant 0 : index
    %c0_46 = arith.constant 0 : index
    %96 = vector.load %arg14[%c0_45, %c0_46] : memref<1x32xf32, #tpu.memory_space<vmem>>, vector<1x32xf32>
    %97 = vector.broadcast %96 : vector<1x32xf32> to vector<8x32xf32>
    %98 = arith.addf %95, %97 : vector<8x32xf32>
    %cst_47 = arith.constant 5.000000e-01 : f32
    %99 = vector.broadcast %cst_47 : f32 to vector<8x32xf32>
    %100 = arith.mulf %99, %98 : vector<8x32xf32>
    %cst_48 = arith.constant 0.707106769 : f32
    %101 = vector.broadcast %cst_48 : f32 to vector<8x32xf32>
    %102 = arith.mulf %98, %101 : vector<8x32xf32>
    %103 = math.absf %102 : vector<8x32xf32>
    %cst_49 = arith.constant 0.327591091 : f32
    %104 = vector.broadcast %cst_49 : f32 to vector<8x32xf32>
    %105 = arith.mulf %104, %103 : vector<8x32xf32>
    %cst_50 = arith.constant 1.000000e+00 : f32
    %106 = vector.broadcast %cst_50 : f32 to vector<8x32xf32>
    %107 = arith.addf %106, %105 : vector<8x32xf32>
    %cst_51 = arith.constant 1.000000e+00 : f32
    %108 = vector.broadcast %cst_51 : f32 to vector<8x32xf32>
    %109 = arith.divf %108, %107 : vector<8x32xf32>
    %cst_52 = arith.constant 1.06140542 : f32
    %110 = vector.broadcast %cst_52 : f32 to vector<8x32xf32>
    %111 = arith.mulf %110, %109 : vector<8x32xf32>
    %cst_53 = arith.constant -1.45315206 : f32
    %112 = vector.broadcast %cst_53 : f32 to vector<8x32xf32>
    %113 = arith.addf %111, %112 : vector<8x32xf32>
    %114 = arith.mulf %113, %109 : vector<8x32xf32>
    %cst_54 = arith.constant 1.42141378 : f32
    %115 = vector.broadcast %cst_54 : f32 to vector<8x32xf32>
    %116 = arith.addf %114, %115 : vector<8x32xf32>
    %117 = arith.mulf %116, %109 : vector<8x32xf32>
    %cst_55 = arith.constant -0.284496725 : f32
    %118 = vector.broadcast %cst_55 : f32 to vector<8x32xf32>
    %119 = arith.addf %117, %118 : vector<8x32xf32>
    %120 = arith.mulf %119, %109 : vector<8x32xf32>
    %cst_56 = arith.constant 0.254829586 : f32
    %121 = vector.broadcast %cst_56 : f32 to vector<8x32xf32>
    %122 = arith.addf %120, %121 : vector<8x32xf32>
    %123 = arith.mulf %122, %109 : vector<8x32xf32>
    %cst_57 = arith.constant 0.000000e+00 : f32
    %124 = vector.broadcast %cst_57 : f32 to vector<8x32xf32>
    %125 = arith.subf %124, %103 : vector<8x32xf32>
    %126 = arith.mulf %125, %103 : vector<8x32xf32>
    %127 = math.exp %126 : vector<8x32xf32>
    %128 = arith.mulf %123, %127 : vector<8x32xf32>
    %cst_58 = arith.constant 1.000000e+00 : f32
    %129 = vector.broadcast %cst_58 : f32 to vector<8x32xf32>
    %130 = arith.subf %129, %128 : vector<8x32xf32>
    %cst_59 = arith.constant 0.000000e+00 : f32
    %131 = vector.broadcast %cst_59 : f32 to vector<8x32xf32>
    %132 = arith.cmpf oge, %102, %131 : vector<8x32xf32>
    %cst_60 = arith.constant 0.000000e+00 : f32
    %133 = vector.broadcast %cst_60 : f32 to vector<8x32xf32>
    %134 = arith.subf %133, %130 : vector<8x32xf32>
    %135 = arith.select %132, %130, %134 : vector<8x32xi1>, vector<8x32xf32>
    %cst_61 = arith.constant 1.000000e+00 : f32
    %136 = vector.broadcast %cst_61 : f32 to vector<8x32xf32>
    %137 = arith.addf %136, %135 : vector<8x32xf32>
    %138 = arith.mulf %100, %137 : vector<8x32xf32>
    %c0_62 = arith.constant 0 : index
    %c0_63 = arith.constant 0 : index
    %139 = vector.load %arg15[%c0_62, %c0_63] : memref<32x32xf32, #tpu.memory_space<vmem>>, vector<32x32xf32>
    %cst_64 = arith.constant dense<0.000000e+00> : vector<8x32xf32>
    %140 = tpu.matmul %138, %139, %cst_64 {dimension_numbers = #tpu.dot_dimension_numbers<[1], [0], [0], [1], [0, 0, 1, 1], [], []>} : vector<8x32xf32>, vector<32x32xf32>, vector<8x32xf32> -> vector<8x32xf32>
    %c0_65 = arith.constant 0 : index
    %c0_66 = arith.constant 0 : index
    %141 = vector.load %arg16[%c0_65, %c0_66] : memref<1x32xf32, #tpu.memory_space<vmem>>, vector<1x32xf32>
    %142 = vector.broadcast %141 : vector<1x32xf32> to vector<8x32xf32>
    %143 = arith.addf %140, %142 : vector<8x32xf32>
    %144 = arith.addf %143, %73 : vector<8x32xf32>
    %c0_67 = arith.constant 0 : index
    %c0_68 = arith.constant 0 : index
    %145 = vector.load %arg17[%c0_67, %c0_68] : memref<8x32xf32, #tpu.memory_space<vmem>>, vector<8x32xf32>
    tpu.vector_store %arg17[%c0_67, %c0_68], %144 {strides = array<i32>} : memref<8x32xf32, #tpu.memory_space<vmem>>, vector<8x32xf32>,
    return
  }
  func.func @transform_0(%arg0: i32) -> (i32, i32) {
    %c0_i32 = arith.constant 0 : i32
    %c0_i32_0 = arith.constant 0 : i32
    return %arg0, %c0_i32 : i32, i32
  }
  func.func @transform_1(%arg0: i32) -> (i32, i32) {
    %c0_i32 = arith.constant 0 : i32
    %c0_i32_0 = arith.constant 0 : i32
    %c0_i32_1 = arith.constant 0 : i32
    return %c0_i32, %c0_i32_0 : i32, i32
  }
  func.func @transform_2(%arg0: i32) -> (i32, i32) {
    %c0_i32 = arith.constant 0 : i32
    %c0_i32_0 = arith.constant 0 : i32
    %c0_i32_1 = arith.constant 0 : i32
    return %c0_i32, %c0_i32_0 : i32, i32
  }
  func.func @transform_3(%arg0: i32) -> (i32, i32) {
    %c0_i32 = arith.constant 0 : i32
    %c0_i32_0 = arith.constant 0 : i32
    %c0_i32_1 = arith.constant 0 : i32
    return %c0_i32, %c0_i32_0 : i32, i32
  }
  func.func @transform_4(%arg0: i32) -> (i32, i32) {
    %c0_i32 = arith.constant 0 : i32
    %c0_i32_0 = arith.constant 0 : i32
    %c0_i32_1 = arith.constant 0 : i32
    return %c0_i32, %c0_i32_0 : i32, i32
  }
  func.func @transform_5(%arg0: i32) -> (i32, i32) {
    %c0_i32 = arith.constant 0 : i32
    %c0_i32_0 = arith.constant 0 : i32
    %c0_i32_1 = arith.constant 0 : i32
    return %c0_i32, %c0_i32_0 : i32, i32
  }
  func.func @transform_6(%arg0: i32) -> (i32, i32) {
    %c0_i32 = arith.constant 0 : i32
    %c0_i32_0 = arith.constant 0 : i32
    %c0_i32_1 = arith.constant 0 : i32
    return %c0_i32, %c0_i32_0 : i32, i32
  }
  func.func @transform_7(%arg0: i32) -> (i32, i32) {
    %c0_i32 = arith.constant 0 : i32
    %c0_i32_0 = arith.constant 0 : i32
    %c0_i32_1 = arith.constant 0 : i32
    return %c0_i32, %c0_i32_0 : i32, i32
  }
  func.func @transform_8(%arg0: i32) -> (i32, i32) {
    %c0_i32 = arith.constant 0 : i32
    %c0_i32_0 = arith.constant 0 : i32
    %c0_i32_1 = arith.constant 0 : i32
    return %c0_i32, %c0_i32_0 : i32, i32
  }
  func.func @transform_9(%arg0: i32) -> (i32, i32) {
    %c0_i32 = arith.constant 0 : i32
    %c0_i32_0 = arith.constant 0 : i32
    %c0_i32_1 = arith.constant 0 : i32
    return %c0_i32, %c0_i32_0 : i32, i32
  }
  func.func @transform_10(%arg0: i32) -> (i32, i32) {
    %c0_i32 = arith.constant 0 : i32
    %c0_i32_0 = arith.constant 0 : i32
    %c0_i32_1 = arith.constant 0 : i32
    return %c0_i32, %c0_i32_0 : i32, i32
  }
  func.func @transform_11(%arg0: i32) -> (i32, i32) {
    %c0_i32 = arith.constant 0 : i32
    %c0_i32_0 = arith.constant 0 : i32
    %c0_i32_1 = arith.constant 0 : i32
    return %c0_i32, %c0_i32_0 : i32, i32
  }
  func.func @transform_12(%arg0: i32) -> (i32, i32) {
    %c0_i32 = arith.constant 0 : i32
    %c0_i32_0 = arith.constant 0 : i32
    %c0_i32_1 = arith.constant 0 : i32
    return %c0_i32, %c0_i32_0 : i32, i32
  }
  func.func @transform_13(%arg0: i32) -> (i32, i32) {
    %c0_i32 = arith.constant 0 : i32
    %c0_i32_0 = arith.constant 0 : i32
    %c0_i32_1 = arith.constant 0 : i32
    return %c0_i32, %c0_i32_0 : i32, i32
  }
  func.func @transform_14(%arg0: i32) -> (i32, i32) {
    %c0_i32 = arith.constant 0 : i32
    %c0_i32_0 = arith.constant 0 : i32
    %c0_i32_1 = arith.constant 0 : i32
    return %c0_i32, %c0_i32_0 : i32, i32
  }
  func.func @transform_15(%arg0: i32) -> (i32, i32) {
    %c0_i32 = arith.constant 0 : i32
    %c0_i32_0 = arith.constant 0 : i32
    %c0_i32_1 = arith.constant 0 : i32
    return %c0_i32, %c0_i32_0 : i32, i32
  }
  func.func @transform_16(%arg0: i32) -> (i32, i32) {
    %c0_i32 = arith.constant 0 : i32
    %c0_i32_0 = arith.constant 0 : i32
    return %arg0, %c0_i32 : i32, i32
  }
}

module attributes {stable_mosaic.version = 11 : i64} {
  func.func @retnet_block_kernel(%arg0: i32, %arg1: memref<8x32xf32, #tpu.memory_space<vmem>>, %arg2: memref<32x96xf32, #tpu.memory_space<vmem>>, %arg3: memref<1x96xf32, #tpu.memory_space<vmem>>, %arg4: memref<8x32xf32, #tpu.memory_space<vmem>>, %arg5: memref<8x32xf32, #tpu.memory_space<vmem>>, %arg6: memref<8x8xf32, #tpu.memory_space<vmem>>, %arg7: memref<1x32xf32, #tpu.memory_space<vmem>>, %arg8: memref<1x32xf32, #tpu.memory_space<vmem>>, %arg9: memref<32x32xf32, #tpu.memory_space<vmem>>, %arg10: memref<1x32xf32, #tpu.memory_space<vmem>>, %arg11: memref<32x32xf32, #tpu.memory_space<vmem>>, %arg12: memref<1x32xf32, #tpu.memory_space<vmem>>, %arg13: memref<32x32xf32, #tpu.memory_space<vmem>>, %arg14: memref<1x32xf32, #tpu.memory_space<vmem>>, %arg15: memref<32x32xf32, #tpu.memory_space<vmem>>, %arg16: memref<1x32xf32, #tpu.memory_space<vmem>>, %arg17: memref<8x32xf32, #tpu.memory_space<vmem>>) attributes {dimension_semantics = [#tpu.dimension_semantics<parallel>], iteration_bounds = array<i64: 2>, scalar_prefetch = 0 : i64, scratch_operands = 0 : i64, tpu.core_type = #tpu.core_type<tc>, window_params = [{transform_indices = @transform_0, window_bounds = array<i64: 8, 32>}, {pipeline_mode = #tpu.pipeline_mode<synchronous>, transform_indices = @transform_1, window_bounds = array<i64: 32, 96>}, {pipeline_mode = #tpu.pipeline_mode<synchronous>, transform_indices = @transform_2, window_bounds = array<i64: 1, 96>}, {pipeline_mode = #tpu.pipeline_mode<synchronous>, transform_indices = @transform_3, window_bounds = array<i64: 8, 32>}, {pipeline_mode = #tpu.pipeline_mode<synchronous>, transform_indices = @transform_4, window_bounds = array<i64: 8, 32>}, {pipeline_mode = #tpu.pipeline_mode<synchronous>, transform_indices = @transform_5, window_bounds = array<i64: 8, 8>}, {pipeline_mode = #tpu.pipeline_mode<synchronous>, transform_indices = @transform_6, window_bounds = array<i64: 1, 32>}, {pipeline_mode = #tpu.pipeline_mode<synchronous>, transform_indices = @transform_7, window_bounds = array<i64: 1, 32>}, {pipeline_mode = #tpu.pipeline_mode<synchronous>, transform_indices = @transform_8, window_bounds = array<i64: 32, 32>}, {pipeline_mode = #tpu.pipeline_mode<synchronous>, transform_indices = @transform_9, window_bounds = array<i64: 1, 32>}, {pipeline_mode = #tpu.pipeline_mode<synchronous>, transform_indices = @transform_10, window_bounds = array<i64: 32, 32>}, {pipeline_mode = #tpu.pipeline_mode<synchronous>, transform_indices = @transform_11, window_bounds = array<i64: 1, 32>}, {pipeline_mode = #tpu.pipeline_mode<synchronous>, transform_indices = @transform_12, window_bounds = array<i64: 32, 32>}, {pipeline_mode = #tpu.pipeline_mode<synchronous>, transform_indices = @transform_13, window_bounds = array<i64: 1, 32>}, {pipeline_mode = #tpu.pipeline_mode<synchronous>, transform_indices = @transform_14, window_bounds = array<i64: 32, 32>}, {pipeline_mode = #tpu.pipeline_mode<synchronous>, transform_indices = @transform_15, window_bounds = array<i64: 1, 32>}, {transform_indices = @transform_16, window_bounds = array<i64: 8, 32>}]} {
    %c0 = arith.constant 0 : index
    %c0_0 = arith.constant 0 : index
    %0 = vector.load %arg1[%c0, %c0_0] : memref<8x32xf32, #tpu.memory_space<vmem>>, vector<8x32xf32>
    %c0_1 = arith.constant 0 : index
    %c0_2 = arith.constant 0 : index
    %1 = vector.load %arg2[%c0_1, %c0_2] : memref<32x96xf32, #tpu.memory_space<vmem>>, vector<32x96xf32>
    %cst = arith.constant dense<0.000000e+00> : vector<8x96xf32>
    %2 = tpu.matmul %0, %1, %cst {dimension_numbers = #tpu.dot_dimension_numbers<[1], [0], [0], [1], [0, 0, 1, 1], [], []>} : vector<8x32xf32>, vector<32x96xf32>, vector<8x96xf32> -> vector<8x96xf32>
    %c0_3 = arith.constant 0 : index
    %c0_4 = arith.constant 0 : index
    %3 = vector.load %arg3[%c0_3, %c0_4] : memref<1x96xf32, #tpu.memory_space<vmem>>, vector<1x96xf32>
    %4 = vector.broadcast %3 : vector<1x96xf32> to vector<8x96xf32>
    %5 = arith.addf %2, %4 : vector<8x96xf32>
    %6 = vector.extract_strided_slice %5 {offsets = [0, 0], sizes = [8, 32], strides = [1, 1]} : vector<8x96xf32> to vector<8x32xf32>
    %7 = vector.shape_cast %6 : vector<8x32xf32> to vector<1x8x32xf32>
    %8 = vector.extract_strided_slice %5 {offsets = [0, 32], sizes = [8, 32], strides = [1, 1]} : vector<8x96xf32> to vector<8x32xf32>
    %9 = vector.shape_cast %8 : vector<8x32xf32> to vector<1x8x32xf32>
    %10 = vector.extract_strided_slice %5 {offsets = [0, 64], sizes = [8, 32], strides = [1, 1]} : vector<8x96xf32> to vector<8x32xf32>
    %11 = vector.shape_cast %10 : vector<8x32xf32> to vector<1x8x32xf32>
    %c0_5 = arith.constant 0 : index
    %c0_6 = arith.constant 0 : index
    %12 = vector.load %arg4[%c0_5, %c0_6] : memref<8x32xf32, #tpu.memory_space<vmem>>, vector<8x32xf32>
    %c0_7 = arith.constant 0 : index
    %c0_8 = arith.constant 0 : index
    %13 = vector.load %arg5[%c0_7, %c0_8] : memref<8x32xf32, #tpu.memory_space<vmem>>, vector<8x32xf32>
    %14 = vector.shape_cast %12 : vector<8x32xf32> to vector<1x8x32xf32>
    %15 = arith.mulf %7, %14 : vector<1x8x32xf32>
    %16 = vector.shape_cast %13 : vector<8x32xf32> to vector<1x8x32xf32>
    %17 = arith.mulf %7, %16 : vector<1x8x32xf32>
    %18 = vector.shape_cast %12 : vector<8x32xf32> to vector<1x8x32xf32>
    %19 = arith.mulf %9, %18 : vector<1x8x32xf32>
    %20 = vector.shape_cast %13 : vector<8x32xf32> to vector<1x8x32xf32>
    %21 = arith.mulf %9, %20 : vector<1x8x32xf32>
    %c0_9 = arith.constant 0 : index
    %c0_10 = arith.constant 0 : index
    %22 = vector.load %arg6[%c0_9, %c0_10] : memref<8x8xf32, #tpu.memory_space<vmem>>, vector<8x8xf32>
    %cst_11 = arith.constant 0.000000e+00 : f32
    %23 = vector.broadcast %cst_11 : f32 to vector<1x8x32xf32>
    "tpu.trace_start"() <{level = 10 : i32, message = "bsf,btf->bst"}> : () -> ()
    %cst_12 = arith.constant dense<0.000000e+00> : vector<1x8x8xf32>
    %24 = tpu.matmul %15, %19, %cst_12 {dimension_numbers = #tpu.dot_dimension_numbers<[2], [2], [1], [1], [0, 0, 0, 1, 1, 1], [0], [0]>} : vector<1x8x32xf32>, vector<1x8x32xf32>, vector<1x8x8xf32> -> vector<1x8x8xf32>
    %cst_13 = arith.constant dense<0.000000e+00> : vector<1x8x8xf32>
    %25 = tpu.matmul %17, %21, %cst_13 {dimension_numbers = #tpu.dot_dimension_numbers<[2], [2], [1], [1], [0, 0, 0, 1, 1, 1], [0], [0]>} : vector<1x8x32xf32>, vector<1x8x32xf32>, vector<1x8x8xf32> -> vector<1x8x8xf32>
    "tpu.trace_stop"() : () -> ()
    %26 = arith.addf %24, %25 : vector<1x8x8xf32>
    %27 = vector.shape_cast %22 : vector<8x8xf32> to vector<1x8x8xf32>
    %28 = arith.mulf %26, %27 : vector<1x8x8xf32>
    "tpu.trace_start"() <{level = 10 : i32, message = "bst,btf->bsf"}> : () -> ()
    %cst_14 = arith.constant dense<0.000000e+00> : vector<1x8x32xf32>
    %29 = tpu.matmul %28, %11, %cst_14 {dimension_numbers = #tpu.dot_dimension_numbers<[2], [1], [1], [2], [0, 0, 0, 1, 1, 2], [0], [0]>} : vector<1x8x8xf32>, vector<1x8x32xf32>, vector<1x8x32xf32> -> vector<1x8x32xf32>
    "tpu.trace_stop"() : () -> ()
    %30 = arith.addf %23, %29 : vector<1x8x32xf32>
    %31 = vector.shape_cast %30 : vector<1x8x32xf32> to vector<8x32xf32>
    %c0_15 = arith.constant 0 : index
    %c0_16 = arith.constant 0 : index
    %32 = vector.load %arg7[%c0_15, %c0_16] : memref<1x32xf32, #tpu.memory_space<vmem>>, vector<1x32xf32>
    %c0_17 = arith.constant 0 : index
    %c0_18 = arith.constant 0 : index
    %33 = vector.load %arg8[%c0_17, %c0_18] : memref<1x32xf32, #tpu.memory_space<vmem>>, vector<1x32xf32>
    %cst_19 = arith.constant dense<0.000000e+00> : vector<8xf32>
    %34 = vector.multi_reduction <add>, %31, %cst_19 [1] : vector<8x32xf32> to vector<8xf32>
    %35 = vector.shape_cast %34 : vector<8xf32> to vector<8x1xf32>
    %cst_20 = arith.constant 3.200000e+01 : f32
    %36 = vector.broadcast %cst_20 : f32 to vector<8x1xf32>
    %37 = arith.divf %35, %36 : vector<8x1xf32>
    %38 = vector.broadcast %37 : vector<8x1xf32> to vector<8x32xf32>
    %39 = arith.subf %31, %38 : vector<8x32xf32>
    %40 = arith.mulf %39, %39 : vector<8x32xf32>
    %cst_21 = arith.constant dense<0.000000e+00> : vector<8xf32>
    %41 = vector.multi_reduction <add>, %40, %cst_21 [1] : vector<8x32xf32> to vector<8xf32>
    %42 = vector.shape_cast %41 : vector<8xf32> to vector<8x1xf32>
    %cst_22 = arith.constant 3.200000e+01 : f32
    %43 = vector.broadcast %cst_22 : f32 to vector<8x1xf32>
    %44 = arith.divf %42, %43 : vector<8x1xf32>
    %cst_23 = arith.constant 9.99999974E-6 : f32
    %45 = vector.broadcast %cst_23 : f32 to vector<8x1xf32>
    %46 = arith.addf %44, %45 : vector<8x1xf32>
    %47 = math.rsqrt %46 : vector<8x1xf32>
    %48 = vector.broadcast %47 : vector<8x1xf32> to vector<8x32xf32>
    %49 = arith.mulf %39, %48 : vector<8x32xf32>
    %50 = vector.broadcast %32 : vector<1x32xf32> to vector<8x32xf32>
    %51 = arith.mulf %49, %50 : vector<8x32xf32>
    %52 = vector.broadcast %33 : vector<1x32xf32> to vector<8x32xf32>
    %53 = arith.addf %51, %52 : vector<8x32xf32>
    %c0_24 = arith.constant 0 : index
    %c0_25 = arith.constant 0 : index
    %54 = vector.load %arg9[%c0_24, %c0_25] : memref<32x32xf32, #tpu.memory_space<vmem>>, vector<32x32xf32>
    %cst_26 = arith.constant dense<0.000000e+00> : vector<8x32xf32>
    %55 = tpu.matmul %0, %54, %cst_26 {dimension_numbers = #tpu.dot_dimension_numbers<[1], [0], [0], [1], [0, 0, 1, 1], [], []>} : vector<8x32xf32>, vector<32x32xf32>, vector<8x32xf32> -> vector<8x32xf32>
    %c0_27 = arith.constant 0 : index
    %c0_28 = arith.constant 0 : index
    %56 = vector.load %arg10[%c0_27, %c0_28] : memref<1x32xf32, #tpu.memory_space<vmem>>, vector<1x32xf32>
    %57 = vector.broadcast %56 : vector<1x32xf32> to vector<8x32xf32>
    %58 = arith.addf %55, %57 : vector<8x32xf32>
    %cst_29 = arith.constant 0.000000e+00 : f32
    %59 = vector.broadcast %cst_29 : f32 to vector<8x32xf32>
    %60 = arith.subf %59, %58 : vector<8x32xf32>
    %61 = math.exp %60 : vector<8x32xf32>
    %cst_30 = arith.constant 1.000000e+00 : f32
    %62 = vector.broadcast %cst_30 : f32 to vector<8x32xf32>
    %63 = arith.addf %62, %61 : vector<8x32xf32>
    %cst_31 = arith.constant 1.000000e+00 : f32
    %64 = vector.broadcast %cst_31 : f32 to vector<8x32xf32>
    %65 = arith.divf %64, %63 : vector<8x32xf32>
    %66 = arith.mulf %58, %65 : vector<8x32xf32>
    %67 = arith.mulf %66, %53 : vector<8x32xf32>
    %c0_32 = arith.constant 0 : index
    %c0_33 = arith.constant 0 : index
    %68 = vector.load %arg11[%c0_32, %c0_33] : memref<32x32xf32, #tpu.memory_space<vmem>>, vector<32x32xf32>
    %cst_34 = arith.constant dense<0.000000e+00> : vector<8x32xf32>
    %69 = tpu.matmul %67, %68, %cst_34 {dimension_numbers = #tpu.dot_dimension_numbers<[1], [0], [0], [1], [0, 0, 1, 1], [], []>} : vector<8x32xf32>, vector<32x32xf32>, vector<8x32xf32> -> vector<8x32xf32>
    %c0_35 = arith.constant 0 : index
    %c0_36 = arith.constant 0 : index
    %70 = vector.load %arg12[%c0_35, %c0_36] : memref<1x32xf32, #tpu.memory_space<vmem>>, vector<1x32xf32>
    %71 = vector.broadcast %70 : vector<1x32xf32> to vector<8x32xf32>
    %72 = arith.addf %69, %71 : vector<8x32xf32>
    %73 = arith.addf %72, %0 : vector<8x32xf32>
    %cst_37 = arith.constant dense<0.000000e+00> : vector<8xf32>
    %74 = vector.multi_reduction <add>, %73, %cst_37 [1] : vector<8x32xf32> to vector<8xf32>
    %75 = vector.shape_cast %74 : vector<8xf32> to vector<8x1xf32>
    %cst_38 = arith.constant 3.200000e+01 : f32
    %76 = vector.broadcast %cst_38 : f32 to vector<8x1xf32>
    %77 = arith.divf %75, %76 : vector<8x1xf32>
    %78 = vector.broadcast %77 : vector<8x1xf32> to vector<8x32xf32>
    %79 = arith.subf %73, %78 : vector<8x32xf32>
    %80 = arith.mulf %79, %79 : vector<8x32xf32>
    %cst_39 = arith.constant dense<0.000000e+00> : vector<8xf32>
    %81 = vector.multi_reduction <add>, %80, %cst_39 [1] : vector<8x32xf32> to vector<8xf32>
    %82 = vector.shape_cast %81 : vector<8xf32> to vector<8x1xf32>
    %cst_40 = arith.constant 3.200000e+01 : f32
    %83 = vector.broadcast %cst_40 : f32 to vector<8x1xf32>
    %84 = arith.divf %82, %83 : vector<8x1xf32>
    %cst_41 = arith.constant 9.99999974E-6 : f32
    %85 = vector.broadcast %cst_41 : f32 to vector<8x1xf32>
    %86 = arith.addf %84, %85 : vector<8x1xf32>
    %87 = math.rsqrt %86 : vector<8x1xf32>
    %88 = vector.broadcast %87 : vector<8x1xf32> to vector<8x32xf32>
    %89 = arith.mulf %79, %88 : vector<8x32xf32>
    %90 = vector.broadcast %32 : vector<1x32xf32> to vector<8x32xf32>
    %91 = arith.mulf %89, %90 : vector<8x32xf32>
    %92 = vector.broadcast %33 : vector<1x32xf32> to vector<8x32xf32>
    %93 = arith.addf %91, %92 : vector<8x32xf32>
    %c0_42 = arith.constant 0 : index
    %c0_43 = arith.constant 0 : index
    %94 = vector.load %arg13[%c0_42, %c0_43] : memref<32x32xf32, #tpu.memory_space<vmem>>, vector<32x32xf32>
    %cst_44 = arith.constant dense<0.000000e+00> : vector<8x32xf32>
    %95 = tpu.matmul %93, %94, %cst_44 {dimension_numbers = #tpu.dot_dimension_numbers<[1], [0], [0], [1], [0, 0, 1, 1], [], []>} : vector<8x32xf32>, vector<32x32xf32>, vector<8x32xf32> -> vector<8x32xf32>
    %c0_45 = arith.constant 0 : index
    %c0_46 = arith.constant 0 : index
    %96 = vector.load %arg14[%c0_45, %c0_46] : memref<1x32xf32, #tpu.memory_space<vmem>>, vector<1x32xf32>
    %97 = vector.broadcast %96 : vector<1x32xf32> to vector<8x32xf32>
    %98 = arith.addf %95, %97 : vector<8x32xf32>
    %cst_47 = arith.constant 5.000000e-01 : f32
    %99 = vector.broadcast %cst_47 : f32 to vector<8x32xf32>
    %100 = arith.mulf %99, %98 : vector<8x32xf32>
    %cst_48 = arith.constant 0.707106769 : f32
    %101 = vector.broadcast %cst_48 : f32 to vector<8x32xf32>
    %102 = arith.mulf %98, %101 : vector<8x32xf32>
    %103 = math.absf %102 : vector<8x32xf32>
    %cst_49 = arith.constant 0.327591091 : f32
    %104 = vector.broadcast %cst_49 : f32 to vector<8x32xf32>
    %105 = arith.mulf %104, %103 : vector<8x32xf32>
    %cst_50 = arith.constant 1.000000e+00 : f32
    %106 = vector.broadcast %cst_50 : f32 to vector<8x32xf32>
    %107 = arith.addf %106, %105 : vector<8x32xf32>
    %cst_51 = arith.constant 1.000000e+00 : f32
    %108 = vector.broadcast %cst_51 : f32 to vector<8x32xf32>
    %109 = arith.divf %108, %107 : vector<8x32xf32>
    %cst_52 = arith.constant 1.06140542 : f32
    %110 = vector.broadcast %cst_52 : f32 to vector<8x32xf32>
    %111 = arith.mulf %110, %109 : vector<8x32xf32>
    %cst_53 = arith.constant -1.45315206 : f32
    %112 = vector.broadcast %cst_53 : f32 to vector<8x32xf32>
    %113 = arith.addf %111, %112 : vector<8x32xf32>
    %114 = arith.mulf %113, %109 : vector<8x32xf32>
    %cst_54 = arith.constant 1.42141378 : f32
    %115 = vector.broadcast %cst_54 : f32 to vector<8x32xf32>
    %116 = arith.addf %114, %115 : vector<8x32xf32>
    %117 = arith.mulf %116, %109 : vector<8x32xf32>
    %cst_55 = arith.constant -0.284496725 : f32
    %118 = vector.broadcast %cst_55 : f32 to vector<8x32xf32>
    %119 = arith.addf %117, %118 : vector<8x32xf32>
    %120 = arith.mulf %119, %109 : vector<8x32xf32>
    %cst_56 = arith.constant 0.254829586 : f32
    %121 = vector.broadcast %cst_56 : f32 to vector<8x32xf32>
    %122 = arith.addf %120, %121 : vector<8x32xf32>
    %123 = arith.mulf %122, %109 : vector<8x32xf32>
    %cst_57 = arith.constant 0.000000e+00 : f32
    %124 = vector.broadcast %cst_57 : f32 to vector<8x32xf32>
    %125 = arith.subf %124, %103 : vector<8x32xf32>
    %126 = arith.mulf %125, %103 : vector<8x32xf32>
    %127 = math.exp %126 : vector<8x32xf32>
    %128 = arith.mulf %123, %127 : vector<8x32xf32>
    %cst_58 = arith.constant 1.000000e+00 : f32
    %129 = vector.broadcast %cst_58 : f32 to vector<8x32xf32>
    %130 = arith.subf %129, %128 : vector<8x32xf32>
    %cst_59 = arith.constant 0.000000e+00 : f32
    %131 = vector.broadcast %cst_59 : f32 to vector<8x32xf32>
    %132 = arith.cmpf oge, %102, %131 : vector<8x32xf32>
    %cst_60 = arith.constant 0.000000e+00 : f32
    %133 = vector.broadcast %cst_60 : f32 to vector<8x32xf32>
    %134 = arith.subf %133, %130 : vector<8x32xf32>
    %135 = arith.select %132, %130, %134 : vector<8x32xi1>, vector<8x32xf32>
    %cst_61 = arith.constant 1.000000e+00 : f32
    %136 = vector.broadcast %cst_61 : f32 to vector<8x32xf32>
    %137 = arith.addf %136, %135 : vector<8x32xf32>
    %138 = arith.mulf %100, %137 : vector<8x32xf32>
    %c0_62 = arith.constant 0 : index
    %c0_63 = arith.constant 0 : index
    %139 = vector.load %arg15[%c0_62, %c0_63] : memref<32x32xf32, #tpu.memory_space<vmem>>, vector<32x32xf32>
    %cst_64 = arith.constant dense<0.000000e+00> : vector<8x32xf32>
    %140 = tpu.matmul %138, %139, %cst_64 {dimension_numbers = #tpu.dot_dimension_numbers<[1], [0], [0], [1], [0, 0, 1, 1], [], []>} : vector<8x32xf32>, vector<32x32xf32>, vector<8x32xf32> -> vector<8x32xf32>
    %c0_65 = arith.constant 0 : index
    %c0_66 = arith.constant 0 : index
    %141 = vector.load %arg16[%c0_65, %c0_66] : memref<1x32xf32, #tpu.memory_space<vmem>>, vector<1x32xf32>
    %142 = vector.broadcast %141 : vector<1x32xf32> to vector<8x32xf32>
    %143 = arith.addf %140, %142 : vector<8x32xf32>
    %144 = arith.addf %143, %73 : vector<8x32xf32>
    %c0_67 = arith.constant 0 : index
    %c0_68 = arith.constant 0 : index
    %145 = vector.load %arg17[%c0_67, %c0_68] : memref<8x32xf32, #tpu.memory_space<vmem>>, vector<8x32xf32>
    tpu.vector_store %arg17[%c0_67, %c0_68], %144 {strides = array<i32>} : memref<8x32xf32, #tpu.memory_space<vmem>>, vector<8x32xf32>,
    return
  }
  func.func @transform_0(%arg0: i32) -> (i32, i32) {
    %c0_i32 = arith.constant 0 : i32
    %c0_i32_0 = arith.constant 0 : i32
    return %arg0, %c0_i32 : i32, i32
  }
  func.func @transform_1(%arg0: i32) -> (i32, i32) {
    %c0_i32 = arith.constant 0 : i32
    %c0_i32_0 = arith.constant 0 : i32
    %c0_i32_1 = arith.constant 0 : i32
    return %c0_i32, %c0_i32_0 : i32, i32
  }
  func.func @transform_2(%arg0: i32) -> (i32, i32) {
    %c0_i32 = arith.constant 0 : i32
    %c0_i32_0 = arith.constant 0 : i32
    %c0_i32_1 = arith.constant 0 : i32
    return %c0_i32, %c0_i32_0 : i32, i32
  }
  func.func @transform_3(%arg0: i32) -> (i32, i32) {
    %c0_i32 = arith.constant 0 : i32
    %c0_i32_0 = arith.constant 0 : i32
    %c0_i32_1 = arith.constant 0 : i32
    return %c0_i32, %c0_i32_0 : i32, i32
  }
  func.func @transform_4(%arg0: i32) -> (i32, i32) {
    %c0_i32 = arith.constant 0 : i32
    %c0_i32_0 = arith.constant 0 : i32
    %c0_i32_1 = arith.constant 0 : i32
    return %c0_i32, %c0_i32_0 : i32, i32
  }
  func.func @transform_5(%arg0: i32) -> (i32, i32) {
    %c0_i32 = arith.constant 0 : i32
    %c0_i32_0 = arith.constant 0 : i32
    %c0_i32_1 = arith.constant 0 : i32
    return %c0_i32, %c0_i32_0 : i32, i32
  }
  func.func @transform_6(%arg0: i32) -> (i32, i32) {
    %c0_i32 = arith.constant 0 : i32
    %c0_i32_0 = arith.constant 0 : i32
    %c0_i32_1 = arith.constant 0 : i32
    return %c0_i32, %c0_i32_0 : i32, i32
  }
  func.func @transform_7(%arg0: i32) -> (i32, i32) {
    %c0_i32 = arith.constant 0 : i32
    %c0_i32_0 = arith.constant 0 : i32
    %c0_i32_1 = arith.constant 0 : i32
    return %c0_i32, %c0_i32_0 : i32, i32
  }
  func.func @transform_8(%arg0: i32) -> (i32, i32) {
    %c0_i32 = arith.constant 0 : i32
    %c0_i32_0 = arith.constant 0 : i32
    %c0_i32_1 = arith.constant 0 : i32
    return %c0_i32, %c0_i32_0 : i32, i32
  }
  func.func @transform_9(%arg0: i32) -> (i32, i32) {
    %c0_i32 = arith.constant 0 : i32
    %c0_i32_0 = arith.constant 0 : i32
    %c0_i32_1 = arith.constant 0 : i32
    return %c0_i32, %c0_i32_0 : i32, i32
  }
  func.func @transform_10(%arg0: i32) -> (i32, i32) {
    %c0_i32 = arith.constant 0 : i32
    %c0_i32_0 = arith.constant 0 : i32
    %c0_i32_1 = arith.constant 0 : i32
    return %c0_i32, %c0_i32_0 : i32, i32
  }
  func.func @transform_11(%arg0: i32) -> (i32, i32) {
    %c0_i32 = arith.constant 0 : i32
    %c0_i32_0 = arith.constant 0 : i32
    %c0_i32_1 = arith.constant 0 : i32
    return %c0_i32, %c0_i32_0 : i32, i32
  }
  func.func @transform_12(%arg0: i32) -> (i32, i32) {
    %c0_i32 = arith.constant 0 : i32
    %c0_i32_0 = arith.constant 0 : i32
    %c0_i32_1 = arith.constant 0 : i32
    return %c0_i32, %c0_i32_0 : i32, i32
  }
  func.func @transform_13(%arg0: i32) -> (i32, i32) {
    %c0_i32 = arith.constant 0 : i32
    %c0_i32_0 = arith.constant 0 : i32
    %c0_i32_1 = arith.constant 0 : i32
    return %c0_i32, %c0_i32_0 : i32, i32
  }
  func.func @transform_14(%arg0: i32) -> (i32, i32) {
    %c0_i32 = arith.constant 0 : i32
    %c0_i32_0 = arith.constant 0 : i32
    %c0_i32_1 = arith.constant 0 : i32
    return %c0_i32, %c0_i32_0 : i32, i32
  }
  func.func @transform_15(%arg0: i32) -> (i32, i32) {
    %c0_i32 = arith.constant 0 : i32
    %c0_i32_0 = arith.constant 0 : i32
    %c0_i32_1 = arith.constant 0 : i32
    return %c0_i32, %c0_i32_0 : i32, i32
  }
  func.func @transform_16(%arg0: i32) -> (i32, i32) {
    %c0_i32 = arith.constant 0 : i32
    %c0_i32_0 = arith.constant 0 : i32
    return %arg0, %c0_i32 : i32, i32
  }
}

</mosaic_0001>

<bundles_post_ra>
// kernel: tpu_custom_call.1
= control target key start
LH: loop header
LB: loop body
LE: loop exit
PB: predicated region body
PF: predicated region fallthrough
CT: control target
= control target key end

     0   :  { %s2702_s0 = inlined_call_operand.hbm [shape: f32[16,32], index: 0, kind: input, shape index: {}]   ;;  %s2703_s1 = inlined_call_operand.hbm [shape: f32[32,96], index: 1, kind: input, shape index: {}]   ;;  %s2704_s2 = inlined_call_operand.vmem [shape: f32[1,96], index: 2, kind: input, shape index: {}]   ;;  %s2705_s3 = inlined_call_operand.hbm [shape: f32[8,32], index: 3, kind: input, shape index: {}]   ;;  %s2706_s4 = inlined_call_operand.hbm [shape: f32[8,32], index: 4, kind: input, shape index: {}]   ;;  %s2707_s5 = inlined_call_operand.hbm [shape: f32[8,8], index: 5, kind: input, shape index: {}]   ;;  %s2708_s6 = inlined_call_operand.vmem [shape: f32[1,32], index: 6, kind: input, shape index: {}]   ;;  %s2709_s7 = inlined_call_operand.vmem [shape: f32[1,32], index: 7, kind: input, shape index: {}]   ;;  %s2710_s8 = inlined_call_operand.hbm [shape: f32[32,32], index: 8, kind: input, shape index: {}]   ;;  %s2711_s9 = inlined_call_operand.vmem [shape: f32[1,32], index: 9, kind: input, shape index: {}]   ;;  %s2712_s10 = inlined_call_operand.vmem [shape: f32[32,32], index: 10, kind: input, shape index: {}]   ;;  %s2713_s11 = inlined_call_operand.vmem [shape: f32[1,32], index: 11, kind: input, shape index: {}]   ;;  %s2714_s12 = inlined_call_operand.hbm [shape: f32[32,32], index: 12, kind: input, shape index: {}]   ;;  %s2715_s13 = inlined_call_operand.vmem [shape: f32[1,32], index: 13, kind: input, shape index: {}]   ;;  %s2716_s14 = inlined_call_operand.hbm [shape: f32[32,32], index: 14, kind: input, shape index: {}]   ;;  %s2717_s15 = inlined_call_operand.vmem [shape: f32[1,32], index: 15, kind: input, shape index: {}]   ;;  %s2718_s16 = inlined_call_operand.hbm [shape: f32[16,32], index: 16, kind: output, shape index: {}]  }
   0x1   :  { %2724 = sst [smem:[#allocation23_spill]] %s2702_s0 }
   0x2   :  { %2725 = sst [smem:[#allocation24_spill]] %s2703_s1 }
   0x3   :  { %2726 = sst [smem:[#allocation25_spill]] %s2708_s6 }
   0x4   :  { %2727 = sst [smem:[#allocation26_spill]] %s2709_s7 }
   0x5   :  { %2728 = sst [smem:[#allocation27_spill]] %s2711_s9 }
   0x6   :  { %2729 = sst [smem:[#allocation28_spill]] %s2713_s11 }
   0x7   :  { %2730 = sst [smem:[#allocation29_spill]] %s2715_s13 }
   0x8   :  { %2731 = sst [smem:[#allocation30_spill]] %s2717_s15 }
   0x9   :  { %2732 = sst [smem:[#allocation31_spill]] %s2718_s16 }
   0xa   :  { %21 = vsyncpa [#allocation3], 0 }
   0xb   :  { %23 = vsyncpa [#allocation3 + $0x1], 0 }
   0xc   :  { %24 = vsyncpa [#allocation6], 0 }
   0xd   :  { %25 = vsyncpa [#allocation9], 0 }
   0xe   :  { %26 = vsyncpa [#allocation12], 0 }
   0xf   :  { %27 = vsyncpa [#allocation15], 0 }
  0x10   :  { %28 = vsyncpa [#allocation4], 0 }
  0x11   :  { %30 = vsyncpa [#allocation4 + $0x1], 0  ;;  %s2261_s21 = smov 0   ;;  %s2263_s22 = smov 0  }
  0x12   :  { %s2265_s23 = smov 0   ;;  %s2267_s24 = smov 0  }
  0x13 LB: > { %s2159_s25 = smov [#allocation5]   ;;  %s2282_s27 = sadd.s32 4294967295, %s2157_s24   ;;  %s2157_s24 = sphi %s2267_s24, %s2765_s24   ;;  %s2153_s23 = sphi %s2265_s23, %s2764_s23   ;;  %s2149_s22 = sphi %s2263_s22, %s2763_s22   ;;  %s2145_s21 = sphi %s2261_s21, %s2762_s21  }
  0x14   : > { %s420_s26 = sshll.u32 %s2159_s25, 4  ;;  %p1537_p0 = scmp.ge.s32.totalorder %s2157_s24, 1  ;;  %s2287_s26 = int_to_ptr.vmem [resolvable:$true] %s420_s26 }
  0x15   : > { %p2721_p1 = scmp.eq.s32.totalorder %s2282_s27, 0  ;;  %p408_p2 = scmp.lt.s32.totalorder %s2157_s24, 3 }
  0x16   : > { %s2160_s29 = smov [#allocation8]   ;;  %s2161_s17 = smov [#allocation11]  }
  0x17   : > { %p2289_p3 = pnand %p1537_p0, %p408_p2  ;;  %s448_s30 = sshll.u32 %s2160_s29, 4  ;;  %s2302_s30 = int_to_ptr.vmem [resolvable:$true] %s448_s30 }
  0x18   : > { %s475_s18 = sshll.u32 %s2161_s17, 4  ;;  %s2735_s1 = sld [smem:[#allocation24_spill]]  ;;  %s2304_s18 = int_to_ptr.vmem [resolvable:$true] %s475_s18 }
  0x19   : > { %s2733_s28 = scalar_select %p2289_p3, 1, 0 }
  0x1a   : > { %p1744_p5 = pneg %p2289_p3 }
  0x1c   : > { %p2298_p6 = pnand %p1744_p5, %p2721_p1 }
  0x1e   : > { %s1849_s25 = scalar_lea.hbm %s2735_s1, 512  ;;  %p2314_p8 = pneg %p2298_p6 }
  0x1f   : > { %p1850_p7 = scmp.ne.s32.totalorder %s2735_s1, %s1849_s25  ;;  %p1856_p11 = scmp.lt.u32.totalorder %s1849_s25, %s2735_s1 }
  0x21   : > { %p1852_p9 = pnand %p2314_p8, %p1850_p7 }
  0x23   : > { %p1853_p10 = pneg %p1852_p9 }
  0x25   : > { %p1858_p12 = pnand %p1856_p11, %p1853_p10 }
  0x27   : > { %1861 = shalt.err (!%p1858_p12)
}
  0x28   : > { %s1862_s15 = scalar_lea.vmem %s2287_s26, 512  ;;  %p1870_p5 = scmp.lt.s32.totalorder %s2287_s26, %s2287_s26 }
  0x29   : > { %p1863_p13 = scmp.ne.s32.totalorder %s2287_s26, %s1862_s15  ;;  %p1871_p4 = scmp.lt.s32.totalorder %s1862_s15, %s1862_s15 }
  0x2b   : > { %p1865_p0 = pnand %p1863_p13, %p2314_p8  ;;  %p1872_p7 = por %p1871_p4, %p1870_p5 }
  0x2d   : > { %p1866_p2 = pneg %p1865_p0 }
  0x2f   : > { %p1873_p9 = pnand %p1872_p7, %p1866_p2 }
  0x31   : > { %1876 = shalt.err (!%p1873_p9)
}
  0x32   : > { %s2162_s16 = smov 128   ;;  %s2163_s13 = smov 8  }
  0x33   : > { %1747 = dma.hbm_to_vmem [thread:$0]  (!%p2298_p6), %s2735_s1, 512, %s2287_s26, [#allocation6], %s2162_s16, %s2162_s16, %s2163_s13  }
  0x34   : > { %s1877_s15 = scalar_lea.hbm %s2706_s4, 128 }
  0x35   : > { %p1878_p4 = scmp.ne.s32.totalorder %s2706_s4, %s1877_s15  ;;  %p1884_p12 = scmp.lt.u32.totalorder %s1877_s15, %s2706_s4 }
  0x37   : > { %p1880_p10 = pnand %p1878_p4, %p2314_p8 }
  0x39   : > { %p1881_p11 = pneg %p1880_p10 }
  0x3b   : > { %p1886_p13 = pnand %p1884_p12, %p1881_p11 }
  0x3d   : > { %1889 = shalt.err (!%p1886_p13)
}
  0x3e   : > { %s1890_s26 = scalar_lea.vmem %s2302_s30, 128  ;;  %p1898_p7 = scmp.lt.s32.totalorder %s2302_s30, %s2302_s30 }
  0x3f   : > { %p1891_p0 = scmp.ne.s32.totalorder %s2302_s30, %s1890_s26  ;;  %p1899_p9 = scmp.lt.s32.totalorder %s1890_s26, %s1890_s26 }
  0x41   : > { %p1893_p2 = pnand %p1891_p0, %p2314_p8  ;;  %p1900_p4 = por %p1899_p9, %p1898_p7 }
  0x43   : > { %p1894_p5 = pneg %p1893_p2 }
  0x45   : > { %p1901_p10 = pnand %p1900_p4, %p1894_p5 }
  0x47   : > { %1904 = shalt.err (!%p1901_p10)
}
  0x48   : > { %1753 = dma.hbm_to_vmem [thread:$0]  (!%p2298_p6), %s2706_s4, 128, %s2302_s30, [#allocation9]  }
  0x49   : > { %s1905_s19 = scalar_lea.hbm %s2710_s8, 512 }
  0x4a   : > { %p1906_p11 = scmp.ne.s32.totalorder %s2710_s8, %s1905_s19  ;;  %p1912_p0 = scmp.lt.u32.totalorder %s1905_s19, %s2710_s8 }
  0x4c   : > { %p1908_p12 = pnand %p1906_p11, %p2314_p8 }
  0x4e   : > { %p1909_p13 = pneg %p1908_p12 }
  0x50   : > { %p1914_p2 = pnand %p1912_p0, %p1909_p13 }
  0x52   : > { %1917 = shalt.err (!%p1914_p2)
}
  0x53   : > { %s1918_s30 = scalar_lea.vmem %s2304_s18, 512  ;;  %p1926_p4 = scmp.lt.s32.totalorder %s2304_s18, %s2304_s18 }
  0x54   : > { %p1919_p5 = scmp.ne.s32.totalorder %s2304_s18, %s1918_s30  ;;  %p1927_p10 = scmp.lt.s32.totalorder %s1918_s30, %s1918_s30 }
  0x56   : > { %p1921_p7 = pnand %p1919_p5, %p2314_p8  ;;  %p1928_p11 = por %p1927_p10, %p1926_p4 }
  0x58   : > { %p1922_p9 = pneg %p1921_p7 }
  0x5a   : > { %p1929_p12 = pnand %p1928_p11, %p1922_p9 }
  0x5c   : > { %1932 = shalt.err (!%p1929_p12)
}
  0x5d   : > { %1759 = dma.hbm_to_vmem [thread:$0]  (!%p2298_p6), %s2710_s8, 512, %s2304_s18, [#allocation12], %s2162_s16, %s2162_s16, %s2163_s13  }
  0x5e   : > { %s2164_s7 = smov [#allocation7]   ;;  %s2165_s11 = smov [#allocation10]  }
  0x5f   : > { %s437_s9 = sshll.u32 %s2164_s7, 4  ;;  %s459_s19 = sshll.u32 %s2165_s11, 4  ;;  %s438_s9 = int_to_ptr.vmem [resolvable:$true] %s437_s9  ;;  %s460_s19 = int_to_ptr.vmem [resolvable:$true] %s459_s19 }
  0x60   : > { %s1933_s17 = scalar_lea.hbm %s2705_s3, 128 }
  0x61   : > { %p1934_p13 = scmp.ne.s32.totalorder %s2705_s3, %s1933_s17  ;;  %p1940_p5 = scmp.lt.u32.totalorder %s1933_s17, %s2705_s3 }
  0x63   : > { %p1936_p0 = pnand %p1934_p13, %p2314_p8 }
  0x65   : > { %p1937_p2 = pneg %p1936_p0 }
  0x67   : > { %p1942_p7 = pnand %p1940_p5, %p1937_p2 }
  0x69   : > { %1945 = shalt.err (!%p1942_p7)
}
  0x6a   : > { %s1946_s18 = scalar_lea.vmem %s438_s9, 128  ;;  %p1954_p11 = scmp.lt.s32.totalorder %s438_s9, %s438_s9 }
  0x6b   : > { %p1947_p9 = scmp.ne.s32.totalorder %s438_s9, %s1946_s18  ;;  %p1955_p12 = scmp.lt.s32.totalorder %s1946_s18, %s1946_s18 }
  0x6d   : > { %p1949_p4 = pnand %p1947_p9, %p2314_p8  ;;  %p1956_p1 = por %p1955_p12, %p1954_p11 }
  0x6f   : > { %p1950_p10 = pneg %p1949_p4 }
  0x71   : > { %p1957_p3 = pnand %p1956_p1, %p1950_p10 }
  0x73   : > { %1960 = shalt.err (!%p1957_p3)
}
  0x74   : > { %1750 = dma.hbm_to_vmem [thread:$0]  (!%p2298_p6), %s2705_s3, 128, %s438_s9, [#allocation6]  }
  0x75   : > { %s1961_s20 = scalar_lea.hbm %s2707_s5, 128 }
  0x76   : > { %p1962_p13 = scmp.ne.s32.totalorder %s2707_s5, %s1961_s20  ;;  %p1968_p3 = scmp.lt.u32.totalorder %s1961_s20, %s2707_s5 }
  0x78   : > { %p1964_p0 = pnand %p1962_p13, %p2314_p8 }
  0x7a   : > { %p1965_p1 = pneg %p1964_p0 }
  0x7c   : > { %p1970_p2 = pnand %p1968_p3, %p1965_p1 }
  0x7e   : > { %1973 = shalt.err (!%p1970_p2)
}
  0x7f   : > { %s1974_s26 = scalar_lea.vmem %s460_s19, 128  ;;  %p1982_p4 = scmp.lt.s32.totalorder %s460_s19, %s460_s19 }
  0x80   : > { %p1975_p5 = scmp.ne.s32.totalorder %s460_s19, %s1974_s26  ;;  %p1983_p10 = scmp.lt.s32.totalorder %s1974_s26, %s1974_s26 }
  0x82   : > { %p1977_p7 = pnand %p1975_p5, %p2314_p8  ;;  %p1984_p11 = por %p1983_p10, %p1982_p4 }
  0x84   : > { %p1978_p9 = pneg %p1977_p7 }
  0x86   : > { %p1985_p12 = pnand %p1984_p11, %p1978_p9 }
  0x88   : > { %1988 = shalt.err (!%p1985_p12)
}
  0x89   : > { %1756 = dma.hbm_to_vmem [thread:$0]  (!%p2298_p6), %s2707_s5, 128, %s460_s19, [#allocation9]  }
  0x8a   : > { %s2166_s6 = smov [#allocation13]   ;;  %s2167_s1 = smov [#allocation14]  }
  0x8b   : > { %s497_s7 = sshll.u32 %s2166_s6, 4  ;;  %s513_s11 = sshll.u32 %s2167_s1, 4  ;;  %s498_s7 = int_to_ptr.vmem [resolvable:$true] %s497_s7  ;;  %s514_s11 = int_to_ptr.vmem [resolvable:$true] %s513_s11 }
  0x8c   : > { %s1989_s17 = scalar_lea.hbm %s2714_s12, 512 }
  0x8d   : > { %p1990_p13 = scmp.ne.s32.totalorder %s2714_s12, %s1989_s17  ;;  %p1996_p3 = scmp.lt.u32.totalorder %s1989_s17, %s2714_s12 }
  0x8f   : > { %p1992_p0 = pnand %p1990_p13, %p2314_p8 }
  0x91   : > { %p1993_p1 = pneg %p1992_p0 }
  0x93   : > { %p1998_p2 = pnand %p1996_p3, %p1993_p1 }
  0x95   : > { %2001 = shalt.err (!%p1998_p2)
}
  0x96   : > { %s2002_s19 = scalar_lea.vmem %s498_s7, 512  ;;  %p2010_p4 = scmp.lt.s32.totalorder %s498_s7, %s498_s7 }
  0x97   : > { %p2003_p5 = scmp.ne.s32.totalorder %s498_s7, %s2002_s19  ;;  %p2011_p10 = scmp.lt.s32.totalorder %s2002_s19, %s2002_s19 }
  0x99   : > { %p2005_p7 = pnand %p2003_p5, %p2314_p8  ;;  %p2012_p11 = por %p2011_p10, %p2010_p4 }
  0x9b   : > { %p2006_p9 = pneg %p2005_p7 }
  0x9d   : > { %p2013_p12 = pnand %p2012_p11, %p2006_p9 }
  0x9f   : > { %2016 = shalt.err (!%p2013_p12)
}
  0xa0   : > { %1762 = dma.hbm_to_vmem [thread:$0]  (!%p2298_p6), %s2714_s12, 512, %s498_s7, [#allocation12], %s2162_s16, %s2162_s16, %s2163_s13  }
  0xa1   : > { %s2017_s25 = scalar_lea.hbm %s2716_s14, 512 }
  0xa2   : > { %p2018_p13 = scmp.ne.s32.totalorder %s2716_s14, %s2017_s25  ;;  %p2024_p3 = scmp.lt.u32.totalorder %s2017_s25, %s2716_s14 }
  0xa4   : > { %p2020_p0 = pnand %p2018_p13, %p2314_p8 }
  0xa6   : > { %p2021_p1 = pneg %p2020_p0 }
  0xa8   : > { %p2026_p2 = pnand %p2024_p3, %p2021_p1 }
  0xaa   : > { %2029 = shalt.err (!%p2026_p2)
}
  0xab   : > { %s2030_s9 = scalar_lea.vmem %s514_s11, 512  ;;  %p2038_p4 = scmp.lt.s32.totalorder %s514_s11, %s514_s11 }
  0xac   : > { %p2031_p5 = scmp.ne.s32.totalorder %s514_s11, %s2030_s9  ;;  %p2039_p10 = scmp.lt.s32.totalorder %s2030_s9, %s2030_s9 }
  0xae   : > { %p2033_p7 = pnand %p2031_p5, %p2314_p8  ;;  %p2040_p11 = por %p2039_p10, %p2038_p4 }
  0xb0   : > { %p2034_p9 = pneg %p2033_p7 }
  0xb2   : > { %p2041_p12 = pnand %p2040_p11, %p2034_p9 }
  0xb4   : > { %2044 = shalt.err (!%p2041_p12)
}
  0xb5   : > { %1765 = dma.hbm_to_vmem [thread:$0]  (!%p2298_p6), %s2716_s14, 512, %s514_s11, [#allocation15], %s2162_s16, %s2162_s16, %s2163_s13  }
  0xb6   : > { %s1536_s0 = sadd.s32 4294967294, %s2157_s24   ;;  %s2467_s29 = sadd.s32 1, %s2157_s24  }
  0xb7   : > { %s43_s18 = sadd.s32 1, %s2153_s23  ;;  %s40_s6 = ssub.s32 %s2157_s24, %s2467_s29 }
  0xb8   : > { %p50_p8 = scmp.ne.s32.totalorder %s2153_s23, %s2149_s22  ;;  %p41_p13 = scmp.eq.s32.totalorder %s40_s6, 0 }
  0xb9   : > { %p51_p0 = scmp.eq.s32.totalorder %s2157_s24, 0  ;;  %p56_p1 = scmp.ne.s32.totalorder %s2149_s22, %s2145_s21 }
  0xba   : > { %p395_p3 = scmp.eq.s32.totalorder %s2282_s27, 1  ;;  %p2737_p5 = scmp.eq.s32.totalorder %s2282_s27, 0 }
  0xbb   : > { %s2479_s1 = scalar_select %p41_p13, %s2153_s23, %s43_s18  }
  0xbc   : > { %p52_p2 = por %p51_p0, %p50_p8  ;;  %p2483_p7 = por %p2737_p5, %p56_p1 }
  0xbd   : > { %p2487_p6 = por %p395_p3, %p50_p8  ;;  %p401_p9 = scmp.eq.s32.totalorder %s1536_s0, 1 }
  0xbe   : > { %p1781_p4 = scmp.lt.s32.totalorder %s2157_s24, 2  ;;  %s530_s13 = sand.u32 1, %s2153_s23  }
  0xbf   : > { %s2739_s16 = scalar_select %p2487_p6, 1, 0 }
  0xc0   : > { %p2493_p10 = por %p401_p9, %p56_p1  ;;  %s1546_s25 = sshll.u32 %s530_s13, 3 }
  0xc1   : > { %s1547_s17 = sshll.u32 %s2157_s24, 7  ;;  %s2741_s26 = sld [smem:[#allocation23_spill]] }
  0xc2   : > { %s2740_s11 = scalar_select %p2493_p10, 1, 0 }
  0xc3   : > { %s534_s7 = scalar_lea.vmem [#allocation2], %s1546_s25  ;;  %p2503_p11 = pnand %p1781_p4, %p52_p2 }
  0xc4   : > { %s541_s19 = sshll.u32 %s534_s7, 4  ;;  %s531_s18 = scalar_lea.sflag [#allocation3], %s530_s13  ;;  %s2507_s19 = int_to_ptr.vmem [resolvable:$true] %s541_s19 }
  0xc5   : > { %p2047_p8 = pneg %p2503_p11 }
  0xc7   : > { %s2501_s9 = scalar_lea.hbm %s2741_s26, %s1547_s17  ;;  %s2050_s15 = scalar_lea.hbm %s2741_s26, 256 }
  0xc8   : > { %s2045_s6 = scalar_lea.hbm %s2501_s9, 128  ;;  %p2051_p1 = scmp.lt.u32.totalorder %s2501_s9, %s2741_s26 }
  0xc9   : > { %p2046_p12 = scmp.ne.s32.totalorder %s2501_s9, %s2045_s6  ;;  %p2052_p3 = scmp.lt.u32.totalorder %s2050_s15, %s2045_s6 }
  0xca   : > { %p2054_p5 = scmp.lt.u32.totalorder %s2045_s6, %s2501_s9 }
  0xcb   : > { %p2048_p13 = pnand %p2047_p8, %p2046_p12  ;;  %p2053_p2 = por %p2052_p3, %p2051_p1 }
  0xcd   : > { %p2049_p0 = pneg %p2048_p13  ;;  %p2055_p9 = por %p2054_p5, %p2053_p2 }
  0xcf   : > { %p2056_p4 = pnand %p2055_p9, %p2049_p0 }
  0xd1   : > { %2059 = shalt.err (!%p2056_p4)
}
  0xd2   : > { %s2060_s13 = scalar_lea.vmem %s2507_s19, 128  ;;  %s2168_s17 = smov [#allocation2]  }
  0xd3   : > { %p2061_p12 = scmp.ne.s32.totalorder %s2507_s19, %s2060_s13  ;;  %s2065_s25 = sshll.u32 %s2168_s17, 4  ;;  %s2066_s25 = int_to_ptr.vmem [resolvable:$false] %s2065_s25 }
  0xd4   : > { %s2067_s30 = scalar_lea.vmem %s2066_s25, 256  ;;  %p2068_p6 = scmp.lt.s32.totalorder %s2507_s19, %s2066_s25 }
  0xd5   : > { %p2063_p13 = pnand %p2061_p12, %p2047_p8  ;;  %p2069_p1 = scmp.lt.s32.totalorder %s2067_s30, %s2060_s13 }
  0xd7   : > { %p2064_p10 = pneg %p2063_p13  ;;  %p2070_p3 = por %p2069_p1, %p2068_p6 }
  0xd9   : > { %p2071_p2 = pnand %p2070_p3, %p2064_p10 }
  0xdb   : > { %2074 = shalt.err (!%p2071_p2)
}
  0xdc   : > { %1769 = dma.hbm_to_vmem [thread:$0]  (!%p2503_p11), %s2501_s9, 128, %s2507_s19, %s531_s18  }
  0xdd   : > { %p2743_p0 = scmp.ne.s32.totalorder %s2733_s28, 0 }
  0xde   : > { %s2537_s6 = sand.u32 (!%p2743_p0), 1, %s2149_s22  }
  0xdf   : > { %550 = sbr.rel (%p2743_p0) target bundleno = 2357 (0x935), region = 84  ;;  %s1549_s15 = sshll.u32 (!%p2743_p0), %s2537_s6, 3 }
  0xe0   : > { %s553_s7 = scalar_lea.sflag (!%p2743_p0), [#allocation3], %s2537_s6  ;;  %s2543_s13 = scalar_lea.vmem (!%p2743_p0), [#allocation2], %s1549_s15 }
  0xe6   : > { %2120 = dma.done.wait (%p2483_p7), %s553_s7, 128  }
  0xe7   : > { %2122 = vsyncadd (%p2483_p7), %s553_s7, 4294967168  ;;  %p2744_p6 = scmp.eq.s32.totalorder %s2282_s27, 0 }
  0xe9   : > { %2124 = dma.done.wait (%p2744_p6), [#allocation6], 640   ;;  %p2745_p10 = pmov %p2744_p6 }
  0xea   : > { %p2746_p11 = pmov %p2744_p6 }
  0xeb   : > { %2126 = vsyncadd (%p2745_p10), [#allocation6], 4294966656 }
  0xec   : > { %2128 = dma.done.wait (%p2746_p11), [#allocation9], 256   ;;  %p2747_p8 = pmov %p2744_p6 }
  0xed   : > { %p2748_p5 = pmov %p2744_p6 }
  0xee   : > { %2130 = vsyncadd (%p2747_p8), [#allocation9], 4294967040 }
  0xef   : > { %2132 = dma.done.wait (%p2748_p5), [#allocation12], 1024   ;;  %p2749_p9 = pmov %p2748_p5 }
  0xf0   : > { %p2750_p7 = pmov %p2748_p5 }
  0xf1   : > { %2134 = vsyncadd (%p2749_p9), [#allocation12], 4294966272 }
  0xf2   : > { %2136 = dma.done.wait (%p2750_p7), [#allocation15], 512   ;;  %p2751_p4 = pmov %p2748_p5 }
  0xf3   : > { %v2169_v0 = vmov 0.0|0.0   ;;  %vm2170_vm0 = vmmov 0   ;;  %v2171_v1 = vmov 0.0   ;;  %v634_v2 = vld [vmem:[#allocation5] sm:$0xff]  ;;  %v635_v3 = vld [vmem:[#allocation5 + $0x8] sm:$0xff]  ;;  %v636_v4 = vld [vmem:[#allocation5 + $0x10] sm:$0xff] }
  0xf4   : > { %2138 = vsyncadd (%p2751_p4), [#allocation15], 4294966784  ;;  %1680 = vmatprep.subr.bf16.mxu0 %v2169_v0  ;;  %1618 = vmatprep.mubr.msk.f32.mxu0 %vm2170_vm0, %v2171_v1  ;;  %v1681_v5 = vpack.c.bf16 %v635_v3, %v634_v2  ;;  %v637_v6 = vld [vmem:[#allocation5 + $0x18] sm:$0xff]  ;;  %v720_v7 = vld [vmem:[#allocation8] sm:$0xff]  ;;  %s2172_s28 = smov 32   ;;  %vm645_vm1 = vcmask 261120  }
  0xf5   : > { %1621 = vmatprep.subr.mxu1 %v2171_v1  ;;  %1623 = vmatprep.mubr.msk.f32.mxu1 %vm2170_vm0, %v2171_v1  ;;  %v1684_v8 = vpack.c.bf16 %v637_v6, %v636_v4  ;;  %v719_v9 = vld [vmem:[#allocation7] sm:$0xff]  ;;  %v2573_v10 = vld [vmem:[%s2543_s13] sm:$0xff]  ;;  %s2173_s19 = smov 64   ;;  %s2174_s0 = smov 96   ;;  %vm895_vm2 = vcmask 64512   ;;  %v1001_v30 = vld [vmem:[#allocation11 + $0x10] sm:$0xff] }
  0xf6   : > { %729 = vrot.lane.b32.xlu0 %v720_v7, %s2172_s28  ;;  %1682 = vmatpush3.bf16.msra.mxu0 %v1681_v5  ;;  %v1558_v12 = vld [vmem:[%s2704_s2] ss:$0 sm:$0xff]  ;;  %v999_v28 = vld [vmem:[#allocation11] sm:$0xff]  ;;  %v1000_v29 = vld [vmem:[#allocation11 + $0x8] sm:$0xff]  ;;  %s2753_s25 = sld [smem:[#allocation25_spill]]  ;;  %s2754_s13 = sld [smem:[#allocation26_spill]] }
  0xf7   : > { %1683 = vmatprep.subr.bf16.mxu0 %v2169_v0  ;;  %v733_v24 = vld [vmem:[#allocation10] sm:$0xff]  ;;  %v1687_v31 = vpack.c.bf16 %v1000_v29, %v999_v28  ;;  %v1089_v45 = vld [vmem:[%s2712_s10 + $0x8] sm:$0xff]  ;;  %v1090_v47 = vld [vmem:[%s2712_s10 + $0x10] sm:$0xff]  ;;  %s2755_s9 = sld [smem:[#allocation28_spill]]  ;;  %s2756_s18 = sld [smem:[#allocation29_spill]] }
  0xf8   : > { %v1002_v32 = vld [vmem:[#allocation11 + $0x18] sm:$0xff]  ;;  %v1091_v48 = vld [vmem:[%s2712_s10 + $0x18] sm:$0xff]  ;;  %v1299_v29 = vld [vmem:[#allocation14] sm:$0xff]  ;;  %s2757_s30 = sld [smem:[#allocation30_spill]]  ;;  %s1576_s7 = sshll.u32 %s2282_s27, 7 }
  0xf9   : > { %v1690_v33 = vpack.c.bf16 %v1002_v32, %v1001_v30  ;;  %v1088_v44 = vld [vmem:[%s2712_s10] sm:$0xff]  ;;  %v1696_v49 = vpack.c.bf16 %v1091_v48, %v1090_v47  ;;  %v1300_v30 = vld [vmem:[#allocation14 + $0x8] sm:$0xff]  ;;  %v1301_v32 = vld [vmem:[#allocation14 + $0x10] sm:$0xff]  ;;  %s1386_s27 = scalar_lea.sflag [#allocation4], %s2537_s6  ;;  %p2759_p13 = scmp.ne.s32.totalorder %s2739_s16, 0 }
  0xfa   : > { %724 = vrot.lane.b32.xlu0 %v719_v9, %s2172_s28  ;;  %1685 = vmatpush3.bf16.msra.mxu0 %v1684_v8  ;;  %v1693_v46 = vpack.c.bf16 %v1089_v45, %v1088_v44 }
  0xfb   : > { %1631 = vmatprep.subr.mxu0 %v2171_v1 }
  0xfc   : > { %v1565_v60 = vld [vmem:[%s2753_s25] ss:$0 sm:$0xff] }
  0xfd   : > { %1619 = vmatmul.mubr.msk.f32.vlgmr.msra.gmra.mrb[0].mxu0 %vm645_vm1, %v2573_v10  ;;  %v1566_v63 = vld [vmem:[%s2754_s13] ss:$0 sm:$0xff]  ;;  %s632_s13 = scalar_lea.vmem [#allocation16], %s1549_s15  ;;  %s2175_s15 = smov [#allocation16]  }
  0xfe   : > { %1633 = vmatprep.mubr.msk.f32.mxu0 %vm2170_vm0, %v2171_v1  ;;  %v1569_v6 = vld [vmem:[%s2755_s9] ss:$0 sm:$0xff]  ;;  %s1399_s28 = sshll.u32 %s632_s13, 4  ;;  %s2079_s17 = sshll.u32 %s2175_s15, 4  ;;  %s2659_s28 = int_to_ptr.vmem [resolvable:$true] %s1399_s28  ;;  %s2080_s17 = int_to_ptr.vmem [resolvable:$false] %s2079_s17 }
  0xff   : > { %s2081_s25 = scalar_lea.vmem %s2080_s17, 256  ;;  %p2082_p2 = scmp.lt.s32.totalorder %s2659_s28, %s2080_s17 }
 0x168   : > { %v730_v11 = vpop.permute.xlu0 %729 }
 0x16c   : > { %v725_v17 = vpop.permute.xlu0 %724 }
 0x1d0   : > { %v715_v13 = vpop.f32.mrb[0].mxu0 }
 0x1d1   : > { %v716_v14 = vadd.f32 %v1558_v12, %v715_v13  ;;  %v1620_v15 = vpop.f32.mrb[1].mxu0 }
 0x1d3   : > { %892 = vrot.lane.b32.xlu0 %v716_v14, %s2173_s19  ;;  %v732_v16 = vmul.f32 %v730_v11, %v716_v14  ;;  %v727_v18 = vmul.f32 %v725_v17, %v716_v14  ;;  %v722_v21 = vmul.f32 %v720_v7, %v716_v14  ;;  %v721_v23 = vmul.f32 %v719_v9, %v716_v14  ;;  %v1188_v17 = vld [vmem:[#allocation13] sm:$0xff]  ;;  %s2758_s19 = sld [smem:[#allocation31_spill]] }
 0x1d5   : > { %735 = vrot.lane.b32.xlu1 %v732_v16, %s2174_s0 }
 0x1d9   : > { %813 = vrot.lane.b32.xlu1 %v727_v18, %s2174_s0  ;;  %s2752_s0 = sld [smem:[#allocation27_spill]]  ;;  %v1189_v18 = vld [vmem:[#allocation13 + $0x8] sm:$0xff] }
 0x1df   : > { %v1567_v50 = vld [vmem:[%s2752_s0] ss:$0 sm:$0xff]  ;;  %s2657_s0 = scalar_lea.hbm %s2758_s19, %s1576_s7 }
 0x245   : > { %v893_v19 = vpop.permute.xlu0 %892 }
 0x246   : > { %1632 = vmatpush3.msra.mxu0 %v893_v19  ;;  %v1699_v19 = vpack.c.bf16 %v1189_v18, %v1188_v17 }
 0x247   : > { %v736_v20 = vpop.permute.xlu1 %735  ;;  %1692 = vmatprep.subr.bf16.mxu0 %v2169_v0 }
 0x248   : > { %1622 = vmatpush3.xpose.msk.msra.mxu1 %vm645_vm1, %v736_v20  ;;  %v1191_v20 = vld [vmem:[#allocation13 + $0x18] sm:$0xff] }
 0x249   : > { %1626 = vmatprep.subr.mxu1 %v2171_v1 }
 0x24b   : > { %v814_v22 = vpop.permute.xlu1 %813  ;;  %1624 = vmatmul.mubr.msk.f32.vlgmr.msra.gmra.mrb[0].mxu1 %vm645_vm1, %v722_v21 }
 0x24c   : > { %1627 = vmatpush3.xpose.msk.msra.mxu1 %vm645_vm1, %v814_v22  ;;  %1628 = vmatprep.mubr.msk.f32.mxu1 %vm2170_vm0, %v2171_v1 }
 0x24d   : > { %1686 = vmatprep.subr.bf16.mxu1 %v2169_v0 }
 0x253   : > { %1629 = vmatmul.mubr.msk.f32.vlgmr.msra.gmra.mrb[0].mxu1 %vm645_vm1, %v721_v23 }
 0x254   : > { %1644 = vmatprep.mubr.msk.f32.mxu1 %vm2170_vm0, %v2171_v1  ;;  %1688 = vmatpush3.bf16.msra.mxu1 %v1687_v31  ;;  %v1705_v31 = vpack.c.bf16 %v1300_v30, %v1299_v29 }
 0x255   : > { %1689 = vmatprep.subr.bf16.mxu1 %v2169_v0 }
 0x258   : > { %1691 = vmatpush3.bf16.msra.mxu1 %v1690_v33  ;;  %v1302_v33 = vld [vmem:[#allocation14 + $0x18] sm:$0xff] }
 0x259   : > { %1698 = vmatprep.subr.bf16.mxu1 %v2169_v0 }
 0x25b   : > { %1645 = vmatmul.mubr.msk.f32.vlgmr.msra.gmra.mrb[2].mxu1 %vm645_vm1, %v2573_v10 }
 0x25c   : > { %1666 = vmatprep.mubr.msk.f32.mxu1 %vm2170_vm0, %v2171_v1  ;;  %1700 = vmatpush3.bf16.msra.mxu1 %v1699_v19 }
 0x25d   : > { %1701 = vmatprep.subr.bf16.mxu1 %v2169_v0 }
 0x326   : > { %v886_v25 = vpop.f32.mrb[0].mxu1 }
 0x327   : > { %v890_v26 = vmul.f32 %v886_v25, %v733_v24  ;;  %v1630_v27 = vpop.f32.mrb[1].mxu1 }
 0x329   : > { %1634 = vmatmul.mubr.msk.f32.vlgmr.msra.gmra.mrb[2].mxu0 %vm895_vm2, %v890_v26 }
 0x32a   : > { %1655 = vmatprep.mubr.msk.f32.mxu0 %vm2170_vm0, %v2171_v1  ;;  %1694 = vmatpush3.bf16.msra.mxu0 %v1693_v46 }
 0x32b   : > { %1695 = vmatprep.subr.bf16.mxu0 %v2169_v0 }
 0x32e   : > { %v1076_v37 = vpop.f32.mrb[2].mxu1  ;;  %1697 = vmatpush3.bf16.msra.mxu0 %v1696_v49 }
 0x32f   : > { %v1646_v38 = vpop.f32.mrb[3].mxu1  ;;  %1704 = vmatprep.subr.bf16.mxu0 %v2169_v0  ;;  %v1077_v51 = vadd.f32 %v1567_v50, %v1076_v37 }
 0x331   : > { %v1080_v52 = vsub.f32 0.0, %v1077_v51 }
 0x333   : > { %v1081_v53 = vmul.f32 1.442695, %v1080_v52 }
 0x335   : > { %1837 = vpow2.f32 %v1081_v53 }
 0x33f   : > { %v1838_v54 = vpop.eup %1837 }
 0x340   : > { %v1083_v57 = vadd.f32 1.0, %v1838_v54 }
 0x3fc   : > { %v965_v34 = vpop.f32.mrb[2].mxu0 }
 0x3fd   : > { %v1635_v35 = vpop.f32.mrb[3].mxu0  ;;  %v971_v36 = vsel %vm645_vm1, %v965_v34, 0.0 }
 0x3fe   : > { %972 = vadd.xlane.f32.xlu1 %v971_v36  ;;  %v1571_v35 = vld [vmem:[%s2756_s18] ss:$0 sm:$0xff]  ;;  %s2075_s18 = scalar_lea.vmem %s2659_s28, 128 }
 0x3ff   : > { %p2076_p12 = scmp.ne.s32.totalorder %s2659_s28, %s2075_s18  ;;  %p2083_p0 = scmp.lt.s32.totalorder %s2081_s25, %s2075_s18 }
 0x401   : > { %p2077_p1 = pnand %p2076_p12, %p2759_p13  ;;  %p2084_p6 = por %p2083_p0, %p2082_p2 }
 0x403   : > { %p2078_p3 = pneg %p2077_p1 }
 0x405   : > { %p2085_p10 = pnand %p2084_p6, %p2078_p3 }
 0x48b   : > { %v973_v39 = vpop.xlane.xlu1 %972 }
 0x48c   : > { %v975_v40 = vmul.f32 0.03125, %v973_v39 }
 0x48e   : > { %v976_v41 = vsub.f32 %v965_v34, %v975_v40  ;;  %v1708_v34 = vpack.c.bf16 %v1302_v33, %v1301_v32 }
 0x490   : > { %v977_v42 = vmul.f32 %v976_v41, %v976_v41 }
 0x492   : > { %v978_v43 = vsel %vm645_vm1, %v977_v42, 0.0 }
 0x493   : > { %979 = vadd.xlane.f32.xlu0 %v978_v43 }
 0x520   : > { %v980_v55 = vpop.xlane.xlu0 %979 }
 0x521   : > { %v981_v56 = vmul.f32 0.03125, %v980_v55 }
 0x523   : > { %v982_v58 = vadd.f32 1e-05, %v981_v56 }
 0x525   : > { %1839 = vrsqrt.f32 %v982_v58 }
 0x526   : > { %1841 = vrcp.f32 %v1083_v57 }
 0x52f   : > { %v1840_v59 = vpop.eup %1839 }
 0x530   : > { %v984_v61 = vmul.f32 %v1840_v59, %v976_v41  ;;  %v1842_v62 = vpop.eup %1841 }
 0x531   : > { %v1086_v3 = vmul.f32 %v1842_v62, %v1077_v51 }
 0x532   : > { %v991_v2 = vmul.f32 %v1565_v60, %v984_v61 }
 0x534   : > { %v998_v4 = vadd.f32 %v1566_v63, %v991_v2 }
 0x536   : > { %v1087_v5 = vmul.f32 %v1086_v3, %v998_v4 }
 0x538   : > { %1656 = vmatmul.mubr.msk.f32.vlgmr.msra.gmra.mrb[4].mxu0 %vm645_vm1, %v1087_v5 }
 0x539   : > { %1677 = vmatprep.mubr.msk.f32.mxu0 %vm2170_vm0, %v2171_v1  ;;  %1706 = vmatpush3.bf16.msra.mxu0 %v1705_v31 }
 0x53a   : > { %1707 = vmatprep.subr.bf16.mxu0 %v2169_v0 }
 0x53d   : > { %1709 = vmatpush3.bf16.msra.mxu0 %v1708_v34 }
 0x60b   : > { %v1168_v7 = vpop.f32.mrb[4].mxu0 }
 0x60c   : > { %v1169_v8 = vadd.f32 %v1569_v6, %v1168_v7  ;;  %v1657_v9 = vpop.f32.mrb[5].mxu0 }
 0x60e   : > { %v2634_v11 = vadd.f32 %v1169_v8, %v2573_v10  ;;  %v1190_v10 = vld [vmem:[#allocation13 + $0x10] sm:$0xff] }
 0x60f   : > { %v1702_v21 = vpack.c.bf16 %v1191_v20, %v1190_v10 }
 0x610   : > { %v1173_v12 = vsel %vm645_vm1, %v2634_v11, 0.0 }
 0x611   : > { %1174 = vadd.xlane.f32.xlu0 %v1173_v12  ;;  %1703 = vmatpush3.bf16.msra.mxu1 %v1702_v21 }
 0x69e   : > { %v1175_v13 = vpop.xlane.xlu0 %1174 }
 0x69f   : > { %v1176_v14 = vmul.f32 0.03125, %v1175_v13 }
 0x6a1   : > { %v1177_v15 = vsub.f32 %v2634_v11, %v1176_v14 }
 0x6a3   : > { %v1178_v16 = vmul.f32 %v1177_v15, %v1177_v15 }
 0x6a5   : > { %v1179_v1 = vsel %vm645_vm1, %v1178_v16, 0.0 }
 0x6a6   : > { %1180 = vadd.xlane.f32.xlu1 %v1179_v1 }
 0x733   : > { %v1181_v22 = vpop.xlane.xlu1 %1180 }
 0x734   : > { %v1182_v23 = vmul.f32 0.03125, %v1181_v22 }
 0x736   : > { %v1183_v24 = vadd.f32 1e-05, %v1182_v23 }
 0x738   : > { %1843 = vrsqrt.f32 %v1183_v24 }
 0x742   : > { %v1844_v25 = vpop.eup %1843 }
 0x743   : > { %v1185_v26 = vmul.f32 %v1844_v25, %v1177_v15 }
 0x745   : > { %v1186_v27 = vmul.f32 %v1565_v60, %v1185_v26 }
 0x747   : > { %v1187_v28 = vadd.f32 %v1566_v63, %v1186_v27  ;;  %v1573_v63 = vld [vmem:[%s2757_s30] ss:$0 sm:$0xff] }
 0x749   : > { %1667 = vmatmul.mubr.msk.f32.vlgmr.msra.gmra.mrb[4].mxu1 %vm645_vm1, %v1187_v28 }
 0x81c   : > { %v1268_v36 = vpop.f32.mrb[4].mxu1 }
 0x81d   : > { %v1269_v37 = vadd.f32 %v1571_v35, %v1268_v36  ;;  %v1668_v38 = vpop.f32.mrb[5].mxu1 }
 0x81f   : > { %v1273_v39 = vmul.f32 0.70710677, %v1269_v37  ;;  %v1272_v60 = vmul.f32 0.5, %v1269_v37 }
 0x821   : > { %v1274_v40 = vand.u32 2147483647, %v1273_v39  ;;  %vm1294_vm3 = vcmp.ge.f32.partialorder %v1273_v39, 0.0 }
 0x823   : > { %v1275_v41 = vmul.f32 0.3275911, %v1274_v40  ;;  %v1288_v43 = vsub.f32 0.0, %v1274_v40 }
 0x825   : > { %v1276_v42 = vadd.f32 1.0, %v1275_v41  ;;  %v1289_v45 = vmul.f32 %v1288_v43, %v1274_v40 }
 0x827   : > { %1845 = vrcp.f32 %v1276_v42  ;;  %v1290_v47 = vmul.f32 1.442695, %v1289_v45 }
 0x829   : > { %1847 = vpow2.f32 %v1290_v47 }
 0x831   : > { %v1846_v44 = vpop.eup %1845 }
 0x832   : > { %v1279_v0 = vmul.f32 1.0614054, %v1846_v44 }
 0x833   : > { %v1848_v55 = vpop.eup %1847 }
 0x834   : > { %v1280_v46 = vadd.f32 -1.4531521, %v1279_v0 }
 0x836   : > { %v1281_v48 = vmul.f32 %v1846_v44, %v1280_v46 }
 0x838   : > { %v1282_v49 = vadd.f32 1.4214138, %v1281_v48 }
 0x83a   : > { %v1283_v50 = vmul.f32 %v1846_v44, %v1282_v49 }
 0x83c   : > { %v1284_v51 = vadd.f32 -0.28449672, %v1283_v50 }
 0x83e   : > { %v1285_v52 = vmul.f32 %v1846_v44, %v1284_v51 }
 0x840   : > { %v1286_v53 = vadd.f32 0.2548296, %v1285_v52 }
 0x842   : > { %v1287_v54 = vmul.f32 %v1846_v44, %v1286_v53 }
 0x844   : > { %v1292_v56 = vmul.f32 %v1848_v55, %v1287_v54 }
 0x846   : > { %v1293_v57 = vsub.f32 1.0, %v1292_v56 }
 0x848   : > { %v1295_v58 = vsub.f32 0.0, %v1293_v57 }
 0x84a   : > { %v1296_v59 = vsel %vm1294_vm3, %v1293_v57, %v1295_v58 }
 0x84b   : > { %v1297_v61 = vadd.f32 1.0, %v1296_v59 }
 0x84d   : > { %v1298_v62 = vmul.f32 %v1297_v61, %v1272_v60 }
 0x84f   : > { %1678 = vmatmul.mubr.msk.f32.vlgmr.msra.gmra.mrb[6].mxu0 %vm645_vm1, %v1298_v62 }
 0x922   : > { %v1379_v2 = vpop.f32.mrb[6].mxu0 }
 0x923   : > { %v1380_v3 = vadd.f32 %v1573_v63, %v1379_v2  ;;  %v1679_v4 = vpop.f32.mrb[7].mxu0 }
 0x925   : > { %v1383_v5 = vadd.f32 %v1380_v3, %v2634_v11 }
 0x927   : > { %1384 = vst.msk [vmem:[%s632_s13] sm:$0xff] %vm645_vm1, %v1383_v5 }
 0x928   : > { %2088 = shalt.err (!%p2085_p10)
}
 0x929   : > { %s2089_s6 = scalar_lea.hbm %s2657_s0, 128  ;;  %s2093_s13 = scalar_lea.hbm %s2758_s19, 256 }
 0x92a   : > { %p2090_p11 = scmp.ne.s32.totalorder %s2657_s0, %s2089_s6  ;;  %p2094_p9 = scmp.lt.u32.totalorder %s2657_s0, %s2758_s19 }
 0x92b   : > { %p2095_p7 = scmp.lt.u32.totalorder %s2093_s13, %s2089_s6  ;;  %p2097_p12 = scmp.lt.u32.totalorder %s2089_s6, %s2657_s0 }
 0x92c   : > { %p2091_p8 = pnand %p2090_p11, %p2759_p13 }
 0x92d   : > { %p2096_p4 = por %p2095_p7, %p2094_p9 }
 0x92e   : > { %p2092_p5 = pneg %p2091_p8 }
 0x92f   : > { %p2098_p1 = por %p2097_p12, %p2096_p4 }
 0x931   : > { %p2099_p3 = pnand %p2098_p1, %p2092_p5 }
 0x933   : > { %2102 = shalt.err (!%p2099_p3)
}
 0x934   : > { %1742 = dma.vmem_to_hbm [thread:$0]  (%p2759_p13), %s2659_s28, 128, %s2657_s0, %s1386_s27  }
 0x935 PF: > { %s1411_s18 = sand.u32 1, %s2145_s21   ;;  %p2760_p2 = scmp.ne.s32.totalorder %s2740_s11, 0 }
 0x936   : > { %p2761_p0 = scmp.ge.s32.totalorder %s2157_s24, 2  ;;  %s1412_s15 = scalar_lea.sflag [#allocation4], %s1411_s18 }
 0x938   : > { %p1771_p6 = pnand %p2761_p0, %p2760_p2 }
 0x93a   : > { %2140 = dma.done.wait (!%p1771_p6), %s1412_s15, 128  }
 0x93b   : > { %2142 = vsyncadd (!%p1771_p6), %s1412_s15, 4294967168  ;;  %p33_p10 = scmp.ge.s32.totalorder %s2467_s29, 4   ;;  %s2762_s21 = smov %s2149_s22 }
 0x93c   : > { %s2763_s22 = smov %s2153_s23  ;;  %s2764_s23 = smov %s2479_s1 }
 0x93d   : > { %s2765_s24 = smov %s2467_s29  ;;  %35 = sbr.rel (!%p33_p10) target bundleno = 19 (0x13), region = 157 }
 0x944   :  { %1417 = vsyncpa [#allocation3], 1 }
 0x945   :  { %1419 = vsyncpa [#allocation3 + $0x1], 1 }
 0x946   :  { %1420 = vsyncpa [#allocation6], 1 }
 0x947   :  { %1421 = vsyncpa [#allocation9], 1 }
 0x948   :  { %1422 = vsyncpa [#allocation12], 1 }
 0x949   :  { %1423 = vsyncpa [#allocation15], 1 }
 0x94a   :  { %1424 = vsyncpa [#allocation4], 1 }
 0x94b   :  { %1426 = vsyncpa [#allocation4 + $0x1], 1 }

// kernel: tpu_custom_call.1
= control target key start
LH: loop header
LB: loop body
LE: loop exit
PB: predicated region body
PF: predicated region fallthrough
CT: control target
= control target key end

     0   :  { %s2702_s0 = inlined_call_operand.hbm [shape: f32[16,32], index: 0, kind: input, shape index: {}]   ;;  %s2703_s1 = inlined_call_operand.hbm [shape: f32[32,96], index: 1, kind: input, shape index: {}]   ;;  %s2704_s2 = inlined_call_operand.vmem [shape: f32[1,96], index: 2, kind: input, shape index: {}]   ;;  %s2705_s3 = inlined_call_operand.hbm [shape: f32[8,32], index: 3, kind: input, shape index: {}]   ;;  %s2706_s4 = inlined_call_operand.hbm [shape: f32[8,32], index: 4, kind: input, shape index: {}]   ;;  %s2707_s5 = inlined_call_operand.hbm [shape: f32[8,8], index: 5, kind: input, shape index: {}]   ;;  %s2708_s6 = inlined_call_operand.vmem [shape: f32[1,32], index: 6, kind: input, shape index: {}]   ;;  %s2709_s7 = inlined_call_operand.vmem [shape: f32[1,32], index: 7, kind: input, shape index: {}]   ;;  %s2710_s8 = inlined_call_operand.hbm [shape: f32[32,32], index: 8, kind: input, shape index: {}]   ;;  %s2711_s9 = inlined_call_operand.vmem [shape: f32[1,32], index: 9, kind: input, shape index: {}]   ;;  %s2712_s10 = inlined_call_operand.vmem [shape: f32[32,32], index: 10, kind: input, shape index: {}]   ;;  %s2713_s11 = inlined_call_operand.vmem [shape: f32[1,32], index: 11, kind: input, shape index: {}]   ;;  %s2714_s12 = inlined_call_operand.hbm [shape: f32[32,32], index: 12, kind: input, shape index: {}]   ;;  %s2715_s13 = inlined_call_operand.vmem [shape: f32[1,32], index: 13, kind: input, shape index: {}]   ;;  %s2716_s14 = inlined_call_operand.hbm [shape: f32[32,32], index: 14, kind: input, shape index: {}]   ;;  %s2717_s15 = inlined_call_operand.vmem [shape: f32[1,32], index: 15, kind: input, shape index: {}]   ;;  %s2718_s16 = inlined_call_operand.hbm [shape: f32[16,32], index: 16, kind: output, shape index: {}]  }
   0x1   :  { %2724 = sst [smem:[#allocation23_spill]] %s2702_s0 }
   0x2   :  { %2725 = sst [smem:[#allocation24_spill]] %s2703_s1 }
   0x3   :  { %2726 = sst [smem:[#allocation25_spill]] %s2708_s6 }
   0x4   :  { %2727 = sst [smem:[#allocation26_spill]] %s2709_s7 }
   0x5   :  { %2728 = sst [smem:[#allocation27_spill]] %s2711_s9 }
   0x6   :  { %2729 = sst [smem:[#allocation28_spill]] %s2713_s11 }
   0x7   :  { %2730 = sst [smem:[#allocation29_spill]] %s2715_s13 }
   0x8   :  { %2731 = sst [smem:[#allocation30_spill]] %s2717_s15 }
   0x9   :  { %2732 = sst [smem:[#allocation31_spill]] %s2718_s16 }
   0xa   :  { %21 = vsyncpa [#allocation3], 0 }
   0xb   :  { %23 = vsyncpa [#allocation3 + $0x1], 0 }
   0xc   :  { %24 = vsyncpa [#allocation6], 0 }
   0xd   :  { %25 = vsyncpa [#allocation9], 0 }
   0xe   :  { %26 = vsyncpa [#allocation12], 0 }
   0xf   :  { %27 = vsyncpa [#allocation15], 0 }
  0x10   :  { %28 = vsyncpa [#allocation4], 0 }
  0x11   :  { %30 = vsyncpa [#allocation4 + $0x1], 0  ;;  %s2261_s21 = smov 0   ;;  %s2263_s22 = smov 0  }
  0x12   :  { %s2265_s23 = smov 0   ;;  %s2267_s24 = smov 0  }
  0x13 LB: > { %s2159_s25 = smov [#allocation5]   ;;  %s2282_s27 = sadd.s32 4294967295, %s2157_s24   ;;  %s2157_s24 = sphi %s2267_s24, %s2765_s24   ;;  %s2153_s23 = sphi %s2265_s23, %s2764_s23   ;;  %s2149_s22 = sphi %s2263_s22, %s2763_s22   ;;  %s2145_s21 = sphi %s2261_s21, %s2762_s21  }
  0x14   : > { %s420_s26 = sshll.u32 %s2159_s25, 4  ;;  %p1537_p0 = scmp.ge.s32.totalorder %s2157_s24, 1  ;;  %s2287_s26 = int_to_ptr.vmem [resolvable:$true] %s420_s26 }
  0x15   : > { %p2721_p1 = scmp.eq.s32.totalorder %s2282_s27, 0  ;;  %p408_p2 = scmp.lt.s32.totalorder %s2157_s24, 3 }
  0x16   : > { %s2160_s29 = smov [#allocation8]   ;;  %s2161_s17 = smov [#allocation11]  }
  0x17   : > { %p2289_p3 = pnand %p1537_p0, %p408_p2  ;;  %s448_s30 = sshll.u32 %s2160_s29, 4  ;;  %s2302_s30 = int_to_ptr.vmem [resolvable:$true] %s448_s30 }
  0x18   : > { %s475_s18 = sshll.u32 %s2161_s17, 4  ;;  %s2735_s1 = sld [smem:[#allocation24_spill]]  ;;  %s2304_s18 = int_to_ptr.vmem [resolvable:$true] %s475_s18 }
  0x19   : > { %s2733_s28 = scalar_select %p2289_p3, 1, 0 }
  0x1a   : > { %p1744_p5 = pneg %p2289_p3 }
  0x1c   : > { %p2298_p6 = pnand %p1744_p5, %p2721_p1 }
  0x1e   : > { %s1849_s25 = scalar_lea.hbm %s2735_s1, 512  ;;  %p2314_p8 = pneg %p2298_p6 }
  0x1f   : > { %p1850_p7 = scmp.ne.s32.totalorder %s2735_s1, %s1849_s25  ;;  %p1856_p11 = scmp.lt.u32.totalorder %s1849_s25, %s2735_s1 }
  0x21   : > { %p1852_p9 = pnand %p2314_p8, %p1850_p7 }
  0x23   : > { %p1853_p10 = pneg %p1852_p9 }
  0x25   : > { %p1858_p12 = pnand %p1856_p11, %p1853_p10 }
  0x27   : > { %1861 = shalt.err (!%p1858_p12)
}
  0x28   : > { %s1862_s15 = scalar_lea.vmem %s2287_s26, 512  ;;  %p1870_p5 = scmp.lt.s32.totalorder %s2287_s26, %s2287_s26 }
  0x29   : > { %p1863_p13 = scmp.ne.s32.totalorder %s2287_s26, %s1862_s15  ;;  %p1871_p4 = scmp.lt.s32.totalorder %s1862_s15, %s1862_s15 }
  0x2b   : > { %p1865_p0 = pnand %p1863_p13, %p2314_p8  ;;  %p1872_p7 = por %p1871_p4, %p1870_p5 }
  0x2d   : > { %p1866_p2 = pneg %p1865_p0 }
  0x2f   : > { %p1873_p9 = pnand %p1872_p7, %p1866_p2 }
  0x31   : > { %1876 = shalt.err (!%p1873_p9)
}
  0x32   : > { %s2162_s16 = smov 128   ;;  %s2163_s13 = smov 8  }
  0x33   : > { %1747 = dma.hbm_to_vmem [thread:$0]  (!%p2298_p6), %s2735_s1, 512, %s2287_s26, [#allocation6], %s2162_s16, %s2162_s16, %s2163_s13  }
  0x34   : > { %s1877_s15 = scalar_lea.hbm %s2706_s4, 128 }
  0x35   : > { %p1878_p4 = scmp.ne.s32.totalorder %s2706_s4, %s1877_s15  ;;  %p1884_p12 = scmp.lt.u32.totalorder %s1877_s15, %s2706_s4 }
  0x37   : > { %p1880_p10 = pnand %p1878_p4, %p2314_p8 }
  0x39   : > { %p1881_p11 = pneg %p1880_p10 }
  0x3b   : > { %p1886_p13 = pnand %p1884_p12, %p1881_p11 }
  0x3d   : > { %1889 = shalt.err (!%p1886_p13)
}
  0x3e   : > { %s1890_s26 = scalar_lea.vmem %s2302_s30, 128  ;;  %p1898_p7 = scmp.lt.s32.totalorder %s2302_s30, %s2302_s30 }
  0x3f   : > { %p1891_p0 = scmp.ne.s32.totalorder %s2302_s30, %s1890_s26  ;;  %p1899_p9 = scmp.lt.s32.totalorder %s1890_s26, %s1890_s26 }
  0x41   : > { %p1893_p2 = pnand %p1891_p0, %p2314_p8  ;;  %p1900_p4 = por %p1899_p9, %p1898_p7 }
  0x43   : > { %p1894_p5 = pneg %p1893_p2 }
  0x45   : > { %p1901_p10 = pnand %p1900_p4, %p1894_p5 }
  0x47   : > { %1904 = shalt.err (!%p1901_p10)
}
  0x48   : > { %1753 = dma.hbm_to_vmem [thread:$0]  (!%p2298_p6), %s2706_s4, 128, %s2302_s30, [#allocation9]  }
  0x49   : > { %s1905_s19 = scalar_lea.hbm %s2710_s8, 512 }
  0x4a   : > { %p1906_p11 = scmp.ne.s32.totalorder %s2710_s8, %s1905_s19  ;;  %p1912_p0 = scmp.lt.u32.totalorder %s1905_s19, %s2710_s8 }
  0x4c   : > { %p1908_p12 = pnand %p1906_p11, %p2314_p8 }
  0x4e   : > { %p1909_p13 = pneg %p1908_p12 }
  0x50   : > { %p1914_p2 = pnand %p1912_p0, %p1909_p13 }
  0x52   : > { %1917 = shalt.err (!%p1914_p2)
}
  0x53   : > { %s1918_s30 = scalar_lea.vmem %s2304_s18, 512  ;;  %p1926_p4 = scmp.lt.s32.totalorder %s2304_s18, %s2304_s18 }
  0x54   : > { %p1919_p5 = scmp.ne.s32.totalorder %s2304_s18, %s1918_s30  ;;  %p1927_p10 = scmp.lt.s32.totalorder %s1918_s30, %s1918_s30 }
  0x56   : > { %p1921_p7 = pnand %p1919_p5, %p2314_p8  ;;  %p1928_p11 = por %p1927_p10, %p1926_p4 }
  0x58   : > { %p1922_p9 = pneg %p1921_p7 }
  0x5a   : > { %p1929_p12 = pnand %p1928_p11, %p1922_p9 }
  0x5c   : > { %1932 = shalt.err (!%p1929_p12)
}
  0x5d   : > { %1759 = dma.hbm_to_vmem [thread:$0]  (!%p2298_p6), %s2710_s8, 512, %s2304_s18, [#allocation12], %s2162_s16, %s2162_s16, %s2163_s13  }
  0x5e   : > { %s2164_s7 = smov [#allocation7]   ;;  %s2165_s11 = smov [#allocation10]  }
  0x5f   : > { %s437_s9 = sshll.u32 %s2164_s7, 4  ;;  %s459_s19 = sshll.u32 %s2165_s11, 4  ;;  %s438_s9 = int_to_ptr.vmem [resolvable:$true] %s437_s9  ;;  %s460_s19 = int_to_ptr.vmem [resolvable:$true] %s459_s19 }
  0x60   : > { %s1933_s17 = scalar_lea.hbm %s2705_s3, 128 }
  0x61   : > { %p1934_p13 = scmp.ne.s32.totalorder %s2705_s3, %s1933_s17  ;;  %p1940_p5 = scmp.lt.u32.totalorder %s1933_s17, %s2705_s3 }
  0x63   : > { %p1936_p0 = pnand %p1934_p13, %p2314_p8 }
  0x65   : > { %p1937_p2 = pneg %p1936_p0 }
  0x67   : > { %p1942_p7 = pnand %p1940_p5, %p1937_p2 }
  0x69   : > { %1945 = shalt.err (!%p1942_p7)
}
  0x6a   : > { %s1946_s18 = scalar_lea.vmem %s438_s9, 128  ;;  %p1954_p11 = scmp.lt.s32.totalorder %s438_s9, %s438_s9 }
  0x6b   : > { %p1947_p9 = scmp.ne.s32.totalorder %s438_s9, %s1946_s18  ;;  %p1955_p12 = scmp.lt.s32.totalorder %s1946_s18, %s1946_s18 }
  0x6d   : > { %p1949_p4 = pnand %p1947_p9, %p2314_p8  ;;  %p1956_p1 = por %p1955_p12, %p1954_p11 }
  0x6f   : > { %p1950_p10 = pneg %p1949_p4 }
  0x71   : > { %p1957_p3 = pnand %p1956_p1, %p1950_p10 }
  0x73   : > { %1960 = shalt.err (!%p1957_p3)
}
  0x74   : > { %1750 = dma.hbm_to_vmem [thread:$0]  (!%p2298_p6), %s2705_s3, 128, %s438_s9, [#allocation6]  }
  0x75   : > { %s1961_s20 = scalar_lea.hbm %s2707_s5, 128 }
  0x76   : > { %p1962_p13 = scmp.ne.s32.totalorder %s2707_s5, %s1961_s20  ;;  %p1968_p3 = scmp.lt.u32.totalorder %s1961_s20, %s2707_s5 }
  0x78   : > { %p1964_p0 = pnand %p1962_p13, %p2314_p8 }
  0x7a   : > { %p1965_p1 = pneg %p1964_p0 }
  0x7c   : > { %p1970_p2 = pnand %p1968_p3, %p1965_p1 }
  0x7e   : > { %1973 = shalt.err (!%p1970_p2)
}
  0x7f   : > { %s1974_s26 = scalar_lea.vmem %s460_s19, 128  ;;  %p1982_p4 = scmp.lt.s32.totalorder %s460_s19, %s460_s19 }
  0x80   : > { %p1975_p5 = scmp.ne.s32.totalorder %s460_s19, %s1974_s26  ;;  %p1983_p10 = scmp.lt.s32.totalorder %s1974_s26, %s1974_s26 }
  0x82   : > { %p1977_p7 = pnand %p1975_p5, %p2314_p8  ;;  %p1984_p11 = por %p1983_p10, %p1982_p4 }
  0x84   : > { %p1978_p9 = pneg %p1977_p7 }
  0x86   : > { %p1985_p12 = pnand %p1984_p11, %p1978_p9 }
  0x88   : > { %1988 = shalt.err (!%p1985_p12)
}
  0x89   : > { %1756 = dma.hbm_to_vmem [thread:$0]  (!%p2298_p6), %s2707_s5, 128, %s460_s19, [#allocation9]  }
  0x8a   : > { %s2166_s6 = smov [#allocation13]   ;;  %s2167_s1 = smov [#allocation14]  }
  0x8b   : > { %s497_s7 = sshll.u32 %s2166_s6, 4  ;;  %s513_s11 = sshll.u32 %s2167_s1, 4  ;;  %s498_s7 = int_to_ptr.vmem [resolvable:$true] %s497_s7  ;;  %s514_s11 = int_to_ptr.vmem [resolvable:$true] %s513_s11 }
  0x8c   : > { %s1989_s17 = scalar_lea.hbm %s2714_s12, 512 }
  0x8d   : > { %p1990_p13 = scmp.ne.s32.totalorder %s2714_s12, %s1989_s17  ;;  %p1996_p3 = scmp.lt.u32.totalorder %s1989_s17, %s2714_s12 }
  0x8f   : > { %p1992_p0 = pnand %p1990_p13, %p2314_p8 }
  0x91   : > { %p1993_p1 = pneg %p1992_p0 }
  0x93   : > { %p1998_p2 = pnand %p1996_p3, %p1993_p1 }
  0x95   : > { %2001 = shalt.err (!%p1998_p2)
}
  0x96   : > { %s2002_s19 = scalar_lea.vmem %s498_s7, 512  ;;  %p2010_p4 = scmp.lt.s32.totalorder %s498_s7, %s498_s7 }
  0x97   : > { %p2003_p5 = scmp.ne.s32.totalorder %s498_s7, %s2002_s19  ;;  %p2011_p10 = scmp.lt.s32.totalorder %s2002_s19, %s2002_s19 }
  0x99   : > { %p2005_p7 = pnand %p2003_p5, %p2314_p8  ;;  %p2012_p11 = por %p2011_p10, %p2010_p4 }
  0x9b   : > { %p2006_p9 = pneg %p2005_p7 }
  0x9d   : > { %p2013_p12 = pnand %p2012_p11, %p2006_p9 }
  0x9f   : > { %2016 = shalt.err (!%p2013_p12)
}
  0xa0   : > { %1762 = dma.hbm_to_vmem [thread:$0]  (!%p2298_p6), %s2714_s12, 512, %s498_s7, [#allocation12], %s2162_s16, %s2162_s16, %s2163_s13  }
  0xa1   : > { %s2017_s25 = scalar_lea.hbm %s2716_s14, 512 }
  0xa2   : > { %p2018_p13 = scmp.ne.s32.totalorder %s2716_s14, %s2017_s25  ;;  %p2024_p3 = scmp.lt.u32.totalorder %s2017_s25, %s2716_s14 }
  0xa4   : > { %p2020_p0 = pnand %p2018_p13, %p2314_p8 }
  0xa6   : > { %p2021_p1 = pneg %p2020_p0 }
  0xa8   : > { %p2026_p2 = pnand %p2024_p3, %p2021_p1 }
  0xaa   : > { %2029 = shalt.err (!%p2026_p2)
}
  0xab   : > { %s2030_s9 = scalar_lea.vmem %s514_s11, 512  ;;  %p2038_p4 = scmp.lt.s32.totalorder %s514_s11, %s514_s11 }
  0xac   : > { %p2031_p5 = scmp.ne.s32.totalorder %s514_s11, %s2030_s9  ;;  %p2039_p10 = scmp.lt.s32.totalorder %s2030_s9, %s2030_s9 }
  0xae   : > { %p2033_p7 = pnand %p2031_p5, %p2314_p8  ;;  %p2040_p11 = por %p2039_p10, %p2038_p4 }
  0xb0   : > { %p2034_p9 = pneg %p2033_p7 }
  0xb2   : > { %p2041_p12 = pnand %p2040_p11, %p2034_p9 }
  0xb4   : > { %2044 = shalt.err (!%p2041_p12)
}
  0xb5   : > { %1765 = dma.hbm_to_vmem [thread:$0]  (!%p2298_p6), %s2716_s14, 512, %s514_s11, [#allocation15], %s2162_s16, %s2162_s16, %s2163_s13  }
  0xb6   : > { %s1536_s0 = sadd.s32 4294967294, %s2157_s24   ;;  %s2467_s29 = sadd.s32 1, %s2157_s24  }
  0xb7   : > { %s43_s18 = sadd.s32 1, %s2153_s23  ;;  %s40_s6 = ssub.s32 %s2157_s24, %s2467_s29 }
  0xb8   : > { %p50_p8 = scmp.ne.s32.totalorder %s2153_s23, %s2149_s22  ;;  %p41_p13 = scmp.eq.s32.totalorder %s40_s6, 0 }
  0xb9   : > { %p51_p0 = scmp.eq.s32.totalorder %s2157_s24, 0  ;;  %p56_p1 = scmp.ne.s32.totalorder %s2149_s22, %s2145_s21 }
  0xba   : > { %p395_p3 = scmp.eq.s32.totalorder %s2282_s27, 1  ;;  %p2737_p5 = scmp.eq.s32.totalorder %s2282_s27, 0 }
  0xbb   : > { %s2479_s1 = scalar_select %p41_p13, %s2153_s23, %s43_s18  }
  0xbc   : > { %p52_p2 = por %p51_p0, %p50_p8  ;;  %p2483_p7 = por %p2737_p5, %p56_p1 }
  0xbd   : > { %p2487_p6 = por %p395_p3, %p50_p8  ;;  %p401_p9 = scmp.eq.s32.totalorder %s1536_s0, 1 }
  0xbe   : > { %p1781_p4 = scmp.lt.s32.totalorder %s2157_s24, 2  ;;  %s530_s13 = sand.u32 1, %s2153_s23  }
  0xbf   : > { %s2739_s16 = scalar_select %p2487_p6, 1, 0 }
  0xc0   : > { %p2493_p10 = por %p401_p9, %p56_p1  ;;  %s1546_s25 = sshll.u32 %s530_s13, 3 }
  0xc1   : > { %s1547_s17 = sshll.u32 %s2157_s24, 7  ;;  %s2741_s26 = sld [smem:[#allocation23_spill]] }
  0xc2   : > { %s2740_s11 = scalar_select %p2493_p10, 1, 0 }
  0xc3   : > { %s534_s7 = scalar_lea.vmem [#allocation2], %s1546_s25  ;;  %p2503_p11 = pnand %p1781_p4, %p52_p2 }
  0xc4   : > { %s541_s19 = sshll.u32 %s534_s7, 4  ;;  %s531_s18 = scalar_lea.sflag [#allocation3], %s530_s13  ;;  %s2507_s19 = int_to_ptr.vmem [resolvable:$true] %s541_s19 }
  0xc5   : > { %p2047_p8 = pneg %p2503_p11 }
  0xc7   : > { %s2501_s9 = scalar_lea.hbm %s2741_s26, %s1547_s17  ;;  %s2050_s15 = scalar_lea.hbm %s2741_s26, 256 }
  0xc8   : > { %s2045_s6 = scalar_lea.hbm %s2501_s9, 128  ;;  %p2051_p1 = scmp.lt.u32.totalorder %s2501_s9, %s2741_s26 }
  0xc9   : > { %p2046_p12 = scmp.ne.s32.totalorder %s2501_s9, %s2045_s6  ;;  %p2052_p3 = scmp.lt.u32.totalorder %s2050_s15, %s2045_s6 }
  0xca   : > { %p2054_p5 = scmp.lt.u32.totalorder %s2045_s6, %s2501_s9 }
  0xcb   : > { %p2048_p13 = pnand %p2047_p8, %p2046_p12  ;;  %p2053_p2 = por %p2052_p3, %p2051_p1 }
  0xcd   : > { %p2049_p0 = pneg %p2048_p13  ;;  %p2055_p9 = por %p2054_p5, %p2053_p2 }
  0xcf   : > { %p2056_p4 = pnand %p2055_p9, %p2049_p0 }
  0xd1   : > { %2059 = shalt.err (!%p2056_p4)
}
  0xd2   : > { %s2060_s13 = scalar_lea.vmem %s2507_s19, 128  ;;  %s2168_s17 = smov [#allocation2]  }
  0xd3   : > { %p2061_p12 = scmp.ne.s32.totalorder %s2507_s19, %s2060_s13  ;;  %s2065_s25 = sshll.u32 %s2168_s17, 4  ;;  %s2066_s25 = int_to_ptr.vmem [resolvable:$false] %s2065_s25 }
  0xd4   : > { %s2067_s30 = scalar_lea.vmem %s2066_s25, 256  ;;  %p2068_p6 = scmp.lt.s32.totalorder %s2507_s19, %s2066_s25 }
  0xd5   : > { %p2063_p13 = pnand %p2061_p12, %p2047_p8  ;;  %p2069_p1 = scmp.lt.s32.totalorder %s2067_s30, %s2060_s13 }
  0xd7   : > { %p2064_p10 = pneg %p2063_p13  ;;  %p2070_p3 = por %p2069_p1, %p2068_p6 }
  0xd9   : > { %p2071_p2 = pnand %p2070_p3, %p2064_p10 }
  0xdb   : > { %2074 = shalt.err (!%p2071_p2)
}
  0xdc   : > { %1769 = dma.hbm_to_vmem [thread:$0]  (!%p2503_p11), %s2501_s9, 128, %s2507_s19, %s531_s18  }
  0xdd   : > { %p2743_p0 = scmp.ne.s32.totalorder %s2733_s28, 0 }
  0xde   : > { %s2537_s6 = sand.u32 (!%p2743_p0), 1, %s2149_s22  }
  0xdf   : > { %550 = sbr.rel (%p2743_p0) target bundleno = 2357 (0x935), region = 84  ;;  %s1549_s15 = sshll.u32 (!%p2743_p0), %s2537_s6, 3 }
  0xe0   : > { %s553_s7 = scalar_lea.sflag (!%p2743_p0), [#allocation3], %s2537_s6  ;;  %s2543_s13 = scalar_lea.vmem (!%p2743_p0), [#allocation2], %s1549_s15 }
  0xe6   : > { %2120 = dma.done.wait (%p2483_p7), %s553_s7, 128  }
  0xe7   : > { %2122 = vsyncadd (%p2483_p7), %s553_s7, 4294967168  ;;  %p2744_p6 = scmp.eq.s32.totalorder %s2282_s27, 0 }
  0xe9   : > { %2124 = dma.done.wait (%p2744_p6), [#allocation6], 640   ;;  %p2745_p10 = pmov %p2744_p6 }
  0xea   : > { %p2746_p11 = pmov %p2744_p6 }
  0xeb   : > { %2126 = vsyncadd (%p2745_p10), [#allocation6], 4294966656 }
  0xec   : > { %2128 = dma.done.wait (%p2746_p11), [#allocation9], 256   ;;  %p2747_p8 = pmov %p2744_p6 }
  0xed   : > { %p2748_p5 = pmov %p2744_p6 }
  0xee   : > { %2130 = vsyncadd (%p2747_p8), [#allocation9], 4294967040 }
  0xef   : > { %2132 = dma.done.wait (%p2748_p5), [#allocation12], 1024   ;;  %p2749_p9 = pmov %p2748_p5 }
  0xf0   : > { %p2750_p7 = pmov %p2748_p5 }
  0xf1   : > { %2134 = vsyncadd (%p2749_p9), [#allocation12], 4294966272 }
  0xf2   : > { %2136 = dma.done.wait (%p2750_p7), [#allocation15], 512   ;;  %p2751_p4 = pmov %p2748_p5 }
  0xf3   : > { %v2169_v0 = vmov 0.0|0.0   ;;  %vm2170_vm0 = vmmov 0   ;;  %v2171_v1 = vmov 0.0   ;;  %v634_v2 = vld [vmem:[#allocation5] sm:$0xff]  ;;  %v635_v3 = vld [vmem:[#allocation5 + $0x8] sm:$0xff]  ;;  %v636_v4 = vld [vmem:[#allocation5 + $0x10] sm:$0xff] }
  0xf4   : > { %2138 = vsyncadd (%p2751_p4), [#allocation15], 4294966784  ;;  %1680 = vmatprep.subr.bf16.mxu0 %v2169_v0  ;;  %1618 = vmatprep.mubr.msk.f32.mxu0 %vm2170_vm0, %v2171_v1  ;;  %v1681_v5 = vpack.c.bf16 %v635_v3, %v634_v2  ;;  %v637_v6 = vld [vmem:[#allocation5 + $0x18] sm:$0xff]  ;;  %v720_v7 = vld [vmem:[#allocation8] sm:$0xff]  ;;  %s2172_s28 = smov 32   ;;  %vm645_vm1 = vcmask 261120  }
  0xf5   : > { %1621 = vmatprep.subr.mxu1 %v2171_v1  ;;  %1623 = vmatprep.mubr.msk.f32.mxu1 %vm2170_vm0, %v2171_v1  ;;  %v1684_v8 = vpack.c.bf16 %v637_v6, %v636_v4  ;;  %v719_v9 = vld [vmem:[#allocation7] sm:$0xff]  ;;  %v2573_v10 = vld [vmem:[%s2543_s13] sm:$0xff]  ;;  %s2173_s19 = smov 64   ;;  %s2174_s0 = smov 96   ;;  %vm895_vm2 = vcmask 64512   ;;  %v1001_v30 = vld [vmem:[#allocation11 + $0x10] sm:$0xff] }
  0xf6   : > { %729 = vrot.lane.b32.xlu0 %v720_v7, %s2172_s28  ;;  %1682 = vmatpush3.bf16.msra.mxu0 %v1681_v5  ;;  %v1558_v12 = vld [vmem:[%s2704_s2] ss:$0 sm:$0xff]  ;;  %v999_v28 = vld [vmem:[#allocation11] sm:$0xff]  ;;  %v1000_v29 = vld [vmem:[#allocation11 + $0x8] sm:$0xff]  ;;  %s2753_s25 = sld [smem:[#allocation25_spill]]  ;;  %s2754_s13 = sld [smem:[#allocation26_spill]] }
  0xf7   : > { %1683 = vmatprep.subr.bf16.mxu0 %v2169_v0  ;;  %v733_v24 = vld [vmem:[#allocation10] sm:$0xff]  ;;  %v1687_v31 = vpack.c.bf16 %v1000_v29, %v999_v28  ;;  %v1089_v45 = vld [vmem:[%s2712_s10 + $0x8] sm:$0xff]  ;;  %v1090_v47 = vld [vmem:[%s2712_s10 + $0x10] sm:$0xff]  ;;  %s2755_s9 = sld [smem:[#allocation28_spill]]  ;;  %s2756_s18 = sld [smem:[#allocation29_spill]] }
  0xf8   : > { %v1002_v32 = vld [vmem:[#allocation11 + $0x18] sm:$0xff]  ;;  %v1091_v48 = vld [vmem:[%s2712_s10 + $0x18] sm:$0xff]  ;;  %v1299_v29 = vld [vmem:[#allocation14] sm:$0xff]  ;;  %s2757_s30 = sld [smem:[#allocation30_spill]]  ;;  %s1576_s7 = sshll.u32 %s2282_s27, 7 }
  0xf9   : > { %v1690_v33 = vpack.c.bf16 %v1002_v32, %v1001_v30  ;;  %v1088_v44 = vld [vmem:[%s2712_s10] sm:$0xff]  ;;  %v1696_v49 = vpack.c.bf16 %v1091_v48, %v1090_v47  ;;  %v1300_v30 = vld [vmem:[#allocation14 + $0x8] sm:$0xff]  ;;  %v1301_v32 = vld [vmem:[#allocation14 + $0x10] sm:$0xff]  ;;  %s1386_s27 = scalar_lea.sflag [#allocation4], %s2537_s6  ;;  %p2759_p13 = scmp.ne.s32.totalorder %s2739_s16, 0 }
  0xfa   : > { %724 = vrot.lane.b32.xlu0 %v719_v9, %s2172_s28  ;;  %1685 = vmatpush3.bf16.msra.mxu0 %v1684_v8  ;;  %v1693_v46 = vpack.c.bf16 %v1089_v45, %v1088_v44 }
  0xfb   : > { %1631 = vmatprep.subr.mxu0 %v2171_v1 }
  0xfc   : > { %v1565_v60 = vld [vmem:[%s2753_s25] ss:$0 sm:$0xff] }
  0xfd   : > { %1619 = vmatmul.mubr.msk.f32.vlgmr.msra.gmra.mrb[0].mxu0 %vm645_vm1, %v2573_v10  ;;  %v1566_v63 = vld [vmem:[%s2754_s13] ss:$0 sm:$0xff]  ;;  %s632_s13 = scalar_lea.vmem [#allocation16], %s1549_s15  ;;  %s2175_s15 = smov [#allocation16]  }
  0xfe   : > { %1633 = vmatprep.mubr.msk.f32.mxu0 %vm2170_vm0, %v2171_v1  ;;  %v1569_v6 = vld [vmem:[%s2755_s9] ss:$0 sm:$0xff]  ;;  %s1399_s28 = sshll.u32 %s632_s13, 4  ;;  %s2079_s17 = sshll.u32 %s2175_s15, 4  ;;  %s2659_s28 = int_to_ptr.vmem [resolvable:$true] %s1399_s28  ;;  %s2080_s17 = int_to_ptr.vmem [resolvable:$false] %s2079_s17 }
  0xff   : > { %s2081_s25 = scalar_lea.vmem %s2080_s17, 256  ;;  %p2082_p2 = scmp.lt.s32.totalorder %s2659_s28, %s2080_s17 }
 0x168   : > { %v730_v11 = vpop.permute.xlu0 %729 }
 0x16c   : > { %v725_v17 = vpop.permute.xlu0 %724 }
 0x1d0   : > { %v715_v13 = vpop.f32.mrb[0].mxu0 }
 0x1d1   : > { %v716_v14 = vadd.f32 %v1558_v12, %v715_v13  ;;  %v1620_v15 = vpop.f32.mrb[1].mxu0 }
 0x1d3   : > { %892 = vrot.lane.b32.xlu0 %v716_v14, %s2173_s19  ;;  %v732_v16 = vmul.f32 %v730_v11, %v716_v14  ;;  %v727_v18 = vmul.f32 %v725_v17, %v716_v14  ;;  %v722_v21 = vmul.f32 %v720_v7, %v716_v14  ;;  %v721_v23 = vmul.f32 %v719_v9, %v716_v14  ;;  %v1188_v17 = vld [vmem:[#allocation13] sm:$0xff]  ;;  %s2758_s19 = sld [smem:[#allocation31_spill]] }
 0x1d5   : > { %735 = vrot.lane.b32.xlu1 %v732_v16, %s2174_s0 }
 0x1d9   : > { %813 = vrot.lane.b32.xlu1 %v727_v18, %s2174_s0  ;;  %s2752_s0 = sld [smem:[#allocation27_spill]]  ;;  %v1189_v18 = vld [vmem:[#allocation13 + $0x8] sm:$0xff] }
 0x1df   : > { %v1567_v50 = vld [vmem:[%s2752_s0] ss:$0 sm:$0xff]  ;;  %s2657_s0 = scalar_lea.hbm %s2758_s19, %s1576_s7 }
 0x245   : > { %v893_v19 = vpop.permute.xlu0 %892 }
 0x246   : > { %1632 = vmatpush3.msra.mxu0 %v893_v19  ;;  %v1699_v19 = vpack.c.bf16 %v1189_v18, %v1188_v17 }
 0x247   : > { %v736_v20 = vpop.permute.xlu1 %735  ;;  %1692 = vmatprep.subr.bf16.mxu0 %v2169_v0 }
 0x248   : > { %1622 = vmatpush3.xpose.msk.msra.mxu1 %vm645_vm1, %v736_v20  ;;  %v1191_v20 = vld [vmem:[#allocation13 + $0x18] sm:$0xff] }
 0x249   : > { %1626 = vmatprep.subr.mxu1 %v2171_v1 }
 0x24b   : > { %v814_v22 = vpop.permute.xlu1 %813  ;;  %1624 = vmatmul.mubr.msk.f32.vlgmr.msra.gmra.mrb[0].mxu1 %vm645_vm1, %v722_v21 }
 0x24c   : > { %1627 = vmatpush3.xpose.msk.msra.mxu1 %vm645_vm1, %v814_v22  ;;  %1628 = vmatprep.mubr.msk.f32.mxu1 %vm2170_vm0, %v2171_v1 }
 0x24d   : > { %1686 = vmatprep.subr.bf16.mxu1 %v2169_v0 }
 0x253   : > { %1629 = vmatmul.mubr.msk.f32.vlgmr.msra.gmra.mrb[0].mxu1 %vm645_vm1, %v721_v23 }
 0x254   : > { %1644 = vmatprep.mubr.msk.f32.mxu1 %vm2170_vm0, %v2171_v1  ;;  %1688 = vmatpush3.bf16.msra.mxu1 %v1687_v31  ;;  %v1705_v31 = vpack.c.bf16 %v1300_v30, %v1299_v29 }
 0x255   : > { %1689 = vmatprep.subr.bf16.mxu1 %v2169_v0 }
 0x258   : > { %1691 = vmatpush3.bf16.msra.mxu1 %v1690_v33  ;;  %v1302_v33 = vld [vmem:[#allocation14 + $0x18] sm:$0xff] }
 0x259   : > { %1698 = vmatprep.subr.bf16.mxu1 %v2169_v0 }
 0x25b   : > { %1645 = vmatmul.mubr.msk.f32.vlgmr.msra.gmra.mrb[2].mxu1 %vm645_vm1, %v2573_v10 }
 0x25c   : > { %1666 = vmatprep.mubr.msk.f32.mxu1 %vm2170_vm0, %v2171_v1  ;;  %1700 = vmatpush3.bf16.msra.mxu1 %v1699_v19 }
 0x25d   : > { %1701 = vmatprep.subr.bf16.mxu1 %v2169_v0 }
 0x326   : > { %v886_v25 = vpop.f32.mrb[0].mxu1 }
 0x327   : > { %v890_v26 = vmul.f32 %v886_v25, %v733_v24  ;;  %v1630_v27 = vpop.f32.mrb[1].mxu1 }
 0x329   : > { %1634 = vmatmul.mubr.msk.f32.vlgmr.msra.gmra.mrb[2].mxu0 %vm895_vm2, %v890_v26 }
 0x32a   : > { %1655 = vmatprep.mubr.msk.f32.mxu0 %vm2170_vm0, %v2171_v1  ;;  %1694 = vmatpush3.bf16.msra.mxu0 %v1693_v46 }
 0x32b   : > { %1695 = vmatprep.subr.bf16.mxu0 %v2169_v0 }
 0x32e   : > { %v1076_v37 = vpop.f32.mrb[2].mxu1  ;;  %1697 = vmatpush3.bf16.msra.mxu0 %v1696_v49 }
 0x32f   : > { %v1646_v38 = vpop.f32.mrb[3].mxu1  ;;  %1704 = vmatprep.subr.bf16.mxu0 %v2169_v0  ;;  %v1077_v51 = vadd.f32 %v1567_v50, %v1076_v37 }
 0x331   : > { %v1080_v52 = vsub.f32 0.0, %v1077_v51 }
 0x333   : > { %v1081_v53 = vmul.f32 1.442695, %v1080_v52 }
 0x335   : > { %1837 = vpow2.f32 %v1081_v53 }
 0x33f   : > { %v1838_v54 = vpop.eup %1837 }
 0x340   : > { %v1083_v57 = vadd.f32 1.0, %v1838_v54 }
 0x3fc   : > { %v965_v34 = vpop.f32.mrb[2].mxu0 }
 0x3fd   : > { %v1635_v35 = vpop.f32.mrb[3].mxu0  ;;  %v971_v36 = vsel %vm645_vm1, %v965_v34, 0.0 }
 0x3fe   : > { %972 = vadd.xlane.f32.xlu1 %v971_v36  ;;  %v1571_v35 = vld [vmem:[%s2756_s18] ss:$0 sm:$0xff]  ;;  %s2075_s18 = scalar_lea.vmem %s2659_s28, 128 }
 0x3ff   : > { %p2076_p12 = scmp.ne.s32.totalorder %s2659_s28, %s2075_s18  ;;  %p2083_p0 = scmp.lt.s32.totalorder %s2081_s25, %s2075_s18 }
 0x401   : > { %p2077_p1 = pnand %p2076_p12, %p2759_p13  ;;  %p2084_p6 = por %p2083_p0, %p2082_p2 }
 0x403   : > { %p2078_p3 = pneg %p2077_p1 }
 0x405   : > { %p2085_p10 = pnand %p2084_p6, %p2078_p3 }
 0x48b   : > { %v973_v39 = vpop.xlane.xlu1 %972 }
 0x48c   : > { %v975_v40 = vmul.f32 0.03125, %v973_v39 }
 0x48e   : > { %v976_v41 = vsub.f32 %v965_v34, %v975_v40  ;;  %v1708_v34 = vpack.c.bf16 %v1302_v33, %v1301_v32 }
 0x490   : > { %v977_v42 = vmul.f32 %v976_v41, %v976_v41 }
 0x492   : > { %v978_v43 = vsel %vm645_vm1, %v977_v42, 0.0 }
 0x493   : > { %979 = vadd.xlane.f32.xlu0 %v978_v43 }
 0x520   : > { %v980_v55 = vpop.xlane.xlu0 %979 }
 0x521   : > { %v981_v56 = vmul.f32 0.03125, %v980_v55 }
 0x523   : > { %v982_v58 = vadd.f32 1e-05, %v981_v56 }
 0x525   : > { %1839 = vrsqrt.f32 %v982_v58 }
 0x526   : > { %1841 = vrcp.f32 %v1083_v57 }
 0x52f   : > { %v1840_v59 = vpop.eup %1839 }
 0x530   : > { %v984_v61 = vmul.f32 %v1840_v59, %v976_v41  ;;  %v1842_v62 = vpop.eup %1841 }
 0x531   : > { %v1086_v3 = vmul.f32 %v1842_v62, %v1077_v51 }
 0x532   : > { %v991_v2 = vmul.f32 %v1565_v60, %v984_v61 }
 0x534   : > { %v998_v4 = vadd.f32 %v1566_v63, %v991_v2 }
 0x536   : > { %v1087_v5 = vmul.f32 %v1086_v3, %v998_v4 }
 0x538   : > { %1656 = vmatmul.mubr.msk.f32.vlgmr.msra.gmra.mrb[4].mxu0 %vm645_vm1, %v1087_v5 }
 0x539   : > { %1677 = vmatprep.mubr.msk.f32.mxu0 %vm2170_vm0, %v2171_v1  ;;  %1706 = vmatpush3.bf16.msra.mxu0 %v1705_v31 }
 0x53a   : > { %1707 = vmatprep.subr.bf16.mxu0 %v2169_v0 }
 0x53d   : > { %1709 = vmatpush3.bf16.msra.mxu0 %v1708_v34 }
 0x60b   : > { %v1168_v7 = vpop.f32.mrb[4].mxu0 }
 0x60c   : > { %v1169_v8 = vadd.f32 %v1569_v6, %v1168_v7  ;;  %v1657_v9 = vpop.f32.mrb[5].mxu0 }
 0x60e   : > { %v2634_v11 = vadd.f32 %v1169_v8, %v2573_v10  ;;  %v1190_v10 = vld [vmem:[#allocation13 + $0x10] sm:$0xff] }
 0x60f   : > { %v1702_v21 = vpack.c.bf16 %v1191_v20, %v1190_v10 }
 0x610   : > { %v1173_v12 = vsel %vm645_vm1, %v2634_v11, 0.0 }
 0x611   : > { %1174 = vadd.xlane.f32.xlu0 %v1173_v12  ;;  %1703 = vmatpush3.bf16.msra.mxu1 %v1702_v21 }
 0x69e   : > { %v1175_v13 = vpop.xlane.xlu0 %1174 }
 0x69f   : > { %v1176_v14 = vmul.f32 0.03125, %v1175_v13 }
 0x6a1   : > { %v1177_v15 = vsub.f32 %v2634_v11, %v1176_v14 }
 0x6a3   : > { %v1178_v16 = vmul.f32 %v1177_v15, %v1177_v15 }
 0x6a5   : > { %v1179_v1 = vsel %vm645_vm1, %v1178_v16, 0.0 }
 0x6a6   : > { %1180 = vadd.xlane.f32.xlu1 %v1179_v1 }
 0x733   : > { %v1181_v22 = vpop.xlane.xlu1 %1180 }
 0x734   : > { %v1182_v23 = vmul.f32 0.03125, %v1181_v22 }
 0x736   : > { %v1183_v24 = vadd.f32 1e-05, %v1182_v23 }
 0x738   : > { %1843 = vrsqrt.f32 %v1183_v24 }
 0x742   : > { %v1844_v25 = vpop.eup %1843 }
 0x743   : > { %v1185_v26 = vmul.f32 %v1844_v25, %v1177_v15 }
 0x745   : > { %v1186_v27 = vmul.f32 %v1565_v60, %v1185_v26 }
 0x747   : > { %v1187_v28 = vadd.f32 %v1566_v63, %v1186_v27  ;;  %v1573_v63 = vld [vmem:[%s2757_s30] ss:$0 sm:$0xff] }
 0x749   : > { %1667 = vmatmul.mubr.msk.f32.vlgmr.msra.gmra.mrb[4].mxu1 %vm645_vm1, %v1187_v28 }
 0x81c   : > { %v1268_v36 = vpop.f32.mrb[4].mxu1 }
 0x81d   : > { %v1269_v37 = vadd.f32 %v1571_v35, %v1268_v36  ;;  %v1668_v38 = vpop.f32.mrb[5].mxu1 }
 0x81f   : > { %v1273_v39 = vmul.f32 0.70710677, %v1269_v37  ;;  %v1272_v60 = vmul.f32 0.5, %v1269_v37 }
 0x821   : > { %v1274_v40 = vand.u32 2147483647, %v1273_v39  ;;  %vm1294_vm3 = vcmp.ge.f32.partialorder %v1273_v39, 0.0 }
 0x823   : > { %v1275_v41 = vmul.f32 0.3275911, %v1274_v40  ;;  %v1288_v43 = vsub.f32 0.0, %v1274_v40 }
 0x825   : > { %v1276_v42 = vadd.f32 1.0, %v1275_v41  ;;  %v1289_v45 = vmul.f32 %v1288_v43, %v1274_v40 }
 0x827   : > { %1845 = vrcp.f32 %v1276_v42  ;;  %v1290_v47 = vmul.f32 1.442695, %v1289_v45 }
 0x829   : > { %1847 = vpow2.f32 %v1290_v47 }
 0x831   : > { %v1846_v44 = vpop.eup %1845 }
 0x832   : > { %v1279_v0 = vmul.f32 1.0614054, %v1846_v44 }
 0x833   : > { %v1848_v55 = vpop.eup %1847 }
 0x834   : > { %v1280_v46 = vadd.f32 -1.4531521, %v1279_v0 }
 0x836   : > { %v1281_v48 = vmul.f32 %v1846_v44, %v1280_v46 }
 0x838   : > { %v1282_v49 = vadd.f32 1.4214138, %v1281_v48 }
 0x83a   : > { %v1283_v50 = vmul.f32 %v1846_v44, %v1282_v49 }
 0x83c   : > { %v1284_v51 = vadd.f32 -0.28449672, %v1283_v50 }
 0x83e   : > { %v1285_v52 = vmul.f32 %v1846_v44, %v1284_v51 }
 0x840   : > { %v1286_v53 = vadd.f32 0.2548296, %v1285_v52 }
 0x842   : > { %v1287_v54 = vmul.f32 %v1846_v44, %v1286_v53 }
 0x844   : > { %v1292_v56 = vmul.f32 %v1848_v55, %v1287_v54 }
 0x846   : > { %v1293_v57 = vsub.f32 1.0, %v1292_v56 }
 0x848   : > { %v1295_v58 = vsub.f32 0.0, %v1293_v57 }
 0x84a   : > { %v1296_v59 = vsel %vm1294_vm3, %v1293_v57, %v1295_v58 }
 0x84b   : > { %v1297_v61 = vadd.f32 1.0, %v1296_v59 }
 0x84d   : > { %v1298_v62 = vmul.f32 %v1297_v61, %v1272_v60 }
 0x84f   : > { %1678 = vmatmul.mubr.msk.f32.vlgmr.msra.gmra.mrb[6].mxu0 %vm645_vm1, %v1298_v62 }
 0x922   : > { %v1379_v2 = vpop.f32.mrb[6].mxu0 }
 0x923   : > { %v1380_v3 = vadd.f32 %v1573_v63, %v1379_v2  ;;  %v1679_v4 = vpop.f32.mrb[7].mxu0 }
 0x925   : > { %v1383_v5 = vadd.f32 %v1380_v3, %v2634_v11 }
 0x927   : > { %1384 = vst.msk [vmem:[%s632_s13] sm:$0xff] %vm645_vm1, %v1383_v5 }
 0x928   : > { %2088 = shalt.err (!%p2085_p10)
}
 0x929   : > { %s2089_s6 = scalar_lea.hbm %s2657_s0, 128  ;;  %s2093_s13 = scalar_lea.hbm %s2758_s19, 256 }
 0x92a   : > { %p2090_p11 = scmp.ne.s32.totalorder %s2657_s0, %s2089_s6  ;;  %p2094_p9 = scmp.lt.u32.totalorder %s2657_s0, %s2758_s19 }
 0x92b   : > { %p2095_p7 = scmp.lt.u32.totalorder %s2093_s13, %s2089_s6  ;;  %p2097_p12 = scmp.lt.u32.totalorder %s2089_s6, %s2657_s0 }
 0x92c   : > { %p2091_p8 = pnand %p2090_p11, %p2759_p13 }
 0x92d   : > { %p2096_p4 = por %p2095_p7, %p2094_p9 }
 0x92e   : > { %p2092_p5 = pneg %p2091_p8 }
 0x92f   : > { %p2098_p1 = por %p2097_p12, %p2096_p4 }
 0x931   : > { %p2099_p3 = pnand %p2098_p1, %p2092_p5 }
 0x933   : > { %2102 = shalt.err (!%p2099_p3)
}
 0x934   : > { %1742 = dma.vmem_to_hbm [thread:$0]  (%p2759_p13), %s2659_s28, 128, %s2657_s0, %s1386_s27  }
 0x935 PF: > { %s1411_s18 = sand.u32 1, %s2145_s21   ;;  %p2760_p2 = scmp.ne.s32.totalorder %s2740_s11, 0 }
 0x936   : > { %p2761_p0 = scmp.ge.s32.totalorder %s2157_s24, 2  ;;  %s1412_s15 = scalar_lea.sflag [#allocation4], %s1411_s18 }
 0x938   : > { %p1771_p6 = pnand %p2761_p0, %p2760_p2 }
 0x93a   : > { %2140 = dma.done.wait (!%p1771_p6), %s1412_s15, 128  }
 0x93b   : > { %2142 = vsyncadd (!%p1771_p6), %s1412_s15, 4294967168  ;;  %p33_p10 = scmp.ge.s32.totalorder %s2467_s29, 4   ;;  %s2762_s21 = smov %s2149_s22 }
 0x93c   : > { %s2763_s22 = smov %s2153_s23  ;;  %s2764_s23 = smov %s2479_s1 }
 0x93d   : > { %s2765_s24 = smov %s2467_s29  ;;  %35 = sbr.rel (!%p33_p10) target bundleno = 19 (0x13), region = 157 }
 0x944   :  { %1417 = vsyncpa [#allocation3], 1 }
 0x945   :  { %1419 = vsyncpa [#allocation3 + $0x1], 1 }
 0x946   :  { %1420 = vsyncpa [#allocation6], 1 }
 0x947   :  { %1421 = vsyncpa [#allocation9], 1 }
 0x948   :  { %1422 = vsyncpa [#allocation12], 1 }
 0x949   :  { %1423 = vsyncpa [#allocation15], 1 }
 0x94a   :  { %1424 = vsyncpa [#allocation4], 1 }
 0x94b   :  { %1426 = vsyncpa [#allocation4 + $0x1], 1 }

</bundles_post_ra>
